<compile_context>
chip_gen: v6e
topology: v6e:2x2x1
jax: 0.10.0
libtpu: 0.0.40
codegen_flags: <defaults>
</compile_context>

<pallas_src>
import functools

import jax
import jax.numpy as jnp
from jax.experimental import pallas as pl
from jax.experimental.pallas import tpu as pltpu


def _pick_row_tile(ho, dtype):
    # Prefer the largest sublane-aligned row tile: per-grid-step overhead
    # (~0.35 us) dominates tiny tiles.  Sub-32-bit dtypes need a multiple of 16
    # (2 rows pack per sublane for bf16).
    min_rows = 8 if jnp.dtype(dtype).itemsize >= 4 else 16
    for tr in (64, 32, 16, 8):
        if tr >= min_rows and ho % tr == 0:
            return tr
    return ho  # fallback: single full-height tile (full-dim blocks are legal)


def _vmem_limit_bytes():
    # v5e/v6e: 128 MiB physical VMEM, v7x: 64 MiB.  Budget ~half the chip,
    # clamped, instead of a one-size 32 MiB cap.
    try:
        cap = pltpu.get_tpu_info().vmem_capacity_bytes
    except Exception:
        cap = 128 * 1024 * 1024
    return int(min(96 * 1024 * 1024, max(32 * 1024 * 1024, cap // 2)))


# -----------------------------------------------------------------------------
# Fused kernel: depthwise 3x3 (+BN1 folded) + ReLU + pointwise 1x1 (+BN2) + ReLU
# -----------------------------------------------------------------------------
def _dsconv_fused_kernel(x_ref, dw_ref, b1_ref, pw_ref, b2_ref, o_ref,
                         *, stride, th):
    # x_ref : (1, Cin, Hp, Wp)      VMEM  padded NCHW image of one batch element
    # dw_ref: (Cin, 9)              SMEM  depthwise taps * BN1 scale, col=kh*3+kw
    # b1_ref: (Cin,)                SMEM  folded BN1 bias
    # pw_ref: (Cin, Cout)           SMEM  pointwise weights * BN2 scale
    # b2_ref: (Cout,)               SMEM  folded BN2 bias
    # o_ref : (1, th, Cout*Wo)      VMEM  lane-dense output row tile
    cin = x_ref.shape[1]
    cout = pw_ref.shape[1]
    wo = o_ref.shape[2] // cout
    t = pl.program_id(1)

    hpt = (th - 1) * stride + 3           # padded rows feeding th output rows
    row0 = t * (th * stride)
    if (th * stride) % 8 == 0:
        row0 = pl.multiple_of(row0, 8)    # sublane-aligned dynamic row offset

    # Pointwise accumulators (one per output channel) -- only Cout + 1 full
    # tiles are live at any point (review item 9).
    z = [jnp.zeros((th, wo), jnp.float32) for _ in range(cout)]

    for ci in range(cin):
        # Load + upcast ONCE per channel (not once per tap).
        xc = x_ref[0, ci, pl.ds(row0, hpt), :].astype(jnp.float32)   # (hpt, Wp)

        # ---- depthwise 3x3 (BN1 scale already folded into the taps) ----
        acc = jnp.zeros((th, wo), jnp.float32)
        for kw in range(3):
            # One W-direction (lane) slice per kw, reused for all three kh taps.
            xw = jax.lax.slice(xc, (0, kw),
                               (hpt, kw + (wo - 1) * stride + 1),
                               (1, stride))                          # (hpt, wo)
            for kh in range(3):
                xt = jax.lax.slice(xw, (kh, 0),
                                   (kh + (th - 1) * stride + 1, wo),
                                   (stride, 1))                      # (th, wo)
                acc = acc + xt * dw_ref[ci, kh * 3 + kw]
        y = jnp.maximum(acc + b1_ref[ci], 0.0)       # BN1 bias + ReLU

        # ---- pointwise 1x1 (BN2 scale folded into weights), unrolled VPU FMAs.
        # Cin=4 / Cout=8 would waste >99% of the MXU; switch to a
        # channels-on-lanes matmul only for Cin/Cout >= ~128.
        for co in range(cout):
            z[co] = z[co] + y * pw_ref[ci, co]

    # Finalize: BN2 bias + ReLU, write each channel into its 16-lane window of
    # the lane-dense (th, Cout*Wo) block; the HBM writeback of this block is a
    # single dense tile.
    for co in range(cout):
        zc = jnp.maximum(z[co] + b2_ref[co], 0.0).astype(o_ref.dtype)
        o_ref[0, :, pl.ds(co * wo, wo)] = zc


def _dsconv_fused(x_pad, dw9, bias1, pwm, bias2, ho, wo, stride, th):
    n, cin, hp, wp = x_pad.shape
    cout = pwm.shape[1]
    nt = ho // th
    kernel = functools.partial(_dsconv_fused_kernel, stride=stride, th=th)
    smem = pl.BlockSpec(memory_space=pltpu.MemorySpace.SMEM)
    return pl.pallas_call(
        kernel,
        # Lane-dense output layout: (N, Ho, Cout*Wo); wrapper restores NCHW.
        out_shape=jax.ShapeDtypeStruct((n, ho, cout * wo), x_pad.dtype),
        grid_spec=pltpu.PrefetchScalarGridSpec(
            num_scalar_prefetch=0,
            # Batch axis first, then row tiles; at real resolutions nt grows so
            # each TensorCore keeps several pipelined steps.
            grid=(n, nt),
            in_specs=[
                # Full padded image per batch element; block index is constant
                # in t, so it is not re-fetched across consecutive row tiles.
                pl.BlockSpec((1, cin, hp, wp), lambda b, t: (b, 0, 0, 0)),
                smem,   # dw9   (Cin, 9)    taps * scale1
                smem,   # bias1 (Cin,)
                smem,   # pwm   (Cin, Cout) weights * scale2
                smem,   # bias2 (Cout,)
            ],
            out_specs=pl.BlockSpec((1, th, cout * wo), lambda b, t: (b, t, 0)),
        ),
        compiler_params=pltpu.CompilerParams(
            dimension_semantics=("parallel", "parallel"),
            vmem_limit_bytes=_vmem_limit_bytes(),
        ),
    )(x_pad, dw9, bias1, pwm, bias2)


# -----------------------------------------------------------------------------
# DSConv forward wrapper (NCHW in, NCHW out — matches PyTorch semantics)
# -----------------------------------------------------------------------------
def dsconv_forward(x_nchw, params, *, stride=1, padding=0, eps=1e-5):
    dw_w = params["dw_w"]            # (C, 1, 3, 3)   PyTorch depthwise layout
    pw_w = params["pw_w"]            # (Cout, C, 1, 1)
    g1, b1, m1, v1 = params["bn1"]   # each (C,)
    g2, b2, m2, v2 = params["bn2"]   # each (Cout,)

    n, c, h, w = x_nchw.shape
    cout = pw_w.shape[0]

    # Fold inference BatchNorm into the weights (scales) and a bias (f32).
    scale1 = (g1 / jnp.sqrt(v1 + eps)).astype(jnp.float32)
    bias1 = (b1 - m1 * scale1).astype(jnp.float32)
    scale2 = (g2 / jnp.sqrt(v2 + eps)).astype(jnp.float32)
    bias2 = (b2 - m2 * scale2).astype(jnp.float32)

    dw9 = dw_w[:, 0].reshape(c, 9).astype(jnp.float32) * scale1[:, None]   # (C,9)
    pwm = (jnp.transpose(pw_w[:, :, 0, 0], (1, 0)).astype(jnp.float32)
           * scale2[None, :])                                              # (C,Cout)

    x = x_nchw
    if padding > 0:
        x = jnp.pad(x, ((0, 0), (0, 0), (padding, padding), (padding, padding)))
    hp, wp = h + 2 * padding, w + 2 * padding
    ho = (hp - 3) // stride + 1
    wo = (wp - 3) // stride + 1

    th = _pick_row_tile(ho, x.dtype)
    out_packed = _dsconv_fused(x, dw9, bias1, pwm, bias2, ho, wo, stride, th)

    # Layout plumbing only: (N, Ho, Cout*Wo) -> (N, Cout, Ho, Wo).
    return jnp.transpose(out_packed.reshape(n, ho, cout, wo), (0, 2, 1, 3))


# -----------------------------------------------------------------------------
# Pure-JAX reference (sanity check)
# -----------------------------------------------------------------------------
def dsconv_reference(x_nchw, params, *, stride=1, padding=0, eps=1e-5):
    dw_w = params["dw_w"]
    pw_w = params["pw_w"]
    g1, b1, m1, v1 = params["bn1"]
    g2, b2, m2, v2 = params["bn2"]
    c = dw_w.shape[0]

    y = jax.lax.conv_general_dilated(
        x_nchw, dw_w, window_strides=(stride, stride),
        padding=[(padding, padding), (padding, padding)],
        dimension_numbers=("NCHW", "OIHW", "NCHW"),
        feature_group_count=c,
    )
    y = (y - m1[None, :, None, None]) / jnp.sqrt(v1[None, :, None, None] + eps)
    y = y * g1[None, :, None, None] + b1[None, :, None, None]
    y = jnp.maximum(y, 0.0)
    y = jax.lax.conv_general_dilated(
        y, pw_w, window_strides=(1, 1), padding=[(0, 0), (0, 0)],
        dimension_numbers=("NCHW", "OIHW", "NCHW"),
    )
    y = (y - m2[None, :, None, None]) / jnp.sqrt(v2[None, :, None, None] + eps)
    y = y * g2[None, :, None, None] + b2[None, :, None, None]
    return jnp.maximum(y, 0.0)


if __name__ == "__main__":
    # DSConv(f_3x3=4, f_1x1=8, stride=1, padding=1) on x of shape (2, 4, 16, 16)
    N, C_IN, C_OUT, H, W = 2, 4, 8, 16, 16
    STRIDE, PADDING = 1, 1

    key = jax.random.PRNGKey(0)
    k = jax.random.split(key, 8)
    x = jax.random.normal(k[0], (N, C_IN, H, W), dtype=jnp.float32)

    params = {
        "dw_w": jax.random.normal(k[1], (C_IN, 1, 3, 3), dtype=jnp.float32) * 0.3,
        "pw_w": jax.random.normal(k[2], (C_OUT, C_IN, 1, 1), dtype=jnp.float32) * 0.3,
        "bn1": (
            1.0 + 0.1 * jax.random.normal(k[3], (C_IN,), dtype=jnp.float32),   # gamma
            0.1 * jax.random.normal(k[4], (C_IN,), dtype=jnp.float32),          # beta
            0.1 * jax.random.normal(k[5], (C_IN,), dtype=jnp.float32),          # running mean
            jnp.abs(1.0 + 0.1 * jax.random.normal(k[6], (C_IN,), dtype=jnp.float32)),  # running var
        ),
        "bn2": (
            1.0 + 0.1 * jax.random.normal(k[7], (C_OUT,), dtype=jnp.float32),
            jnp.linspace(-0.1, 0.1, C_OUT, dtype=jnp.float32),
            jnp.linspace(-0.05, 0.05, C_OUT, dtype=jnp.float32),
            jnp.linspace(0.9, 1.1, C_OUT, dtype=jnp.float32),
        ),
    }

    fwd = jax.jit(functools.partial(dsconv_forward, stride=STRIDE, padding=PADDING))
    out = jax.block_until_ready(fwd(x, params))

    ref = dsconv_reference(x, params, stride=STRIDE, padding=PADDING)
    assert out.shape == ref.shape == (N, C_OUT, H, W), (out.shape, ref.shape)
    assert jnp.allclose(out, ref, atol=1e-3, rtol=1e-3), float(jnp.max(jnp.abs(out - ref)))

    print("KERNEL_OK")
</pallas_src>

<mosaic_0001>
module attributes {stable_mosaic.version = 11 : i64} {
  func.func @_dsconv_fused_kernel(%arg0: i32, %arg1: i32, %arg2: memref<1x4x18x18xf32, #tpu.memory_space<vmem>>, %arg3: memref<4x9xf32, #tpu.memory_space<smem>>, %arg4: memref<4xf32, #tpu.memory_space<smem>>, %arg5: memref<4x8xf32, #tpu.memory_space<smem>>, %arg6: memref<8xf32, #tpu.memory_space<smem>>, %arg7: memref<1x16x128xf32, #tpu.memory_space<vmem>>) attributes {dimension_semantics = [#tpu.dimension_semantics<parallel>, #tpu.dimension_semantics<parallel>], iteration_bounds = array<i64: 2, 1>, scalar_prefetch = 0 : i64, scratch_operands = 0 : i64, tpu.core_type = #tpu.core_type<tc>, window_params = [{transform_indices = @transform_0, window_bounds = array<i64: 1, 4, 18, 18>}, {transform_indices = @transform_1, window_bounds = array<i64: 4, 9>}, {transform_indices = @transform_2, window_bounds = array<i64: 4>}, {transform_indices = @transform_3, window_bounds = array<i64: 4, 8>}, {transform_indices = @transform_4, window_bounds = array<i64: 8>}, {transform_indices = @transform_5, window_bounds = array<i64: 1, 16, 128>}]} {
    %c16_i32 = arith.constant 16 : i32
    %0 = arith.muli %arg1, %c16_i32 : i32
    %1 = tpu.assume_multiple %0, 8 : i32
    %cst = arith.constant 0.000000e+00 : f32
    %2 = vector.broadcast %cst : f32 to vector<16x16xf32>
    %cst_0 = arith.constant 0.000000e+00 : f32
    %3 = vector.broadcast %cst_0 : f32 to vector<16x16xf32>
    %cst_1 = arith.constant 0.000000e+00 : f32
    %4 = vector.broadcast %cst_1 : f32 to vector<16x16xf32>
    %cst_2 = arith.constant 0.000000e+00 : f32
    %5 = vector.broadcast %cst_2 : f32 to vector<16x16xf32>
    %cst_3 = arith.constant 0.000000e+00 : f32
    %6 = vector.broadcast %cst_3 : f32 to vector<16x16xf32>
    %cst_4 = arith.constant 0.000000e+00 : f32
    %7 = vector.broadcast %cst_4 : f32 to vector<16x16xf32>
    %cst_5 = arith.constant 0.000000e+00 : f32
    %8 = vector.broadcast %cst_5 : f32 to vector<16x16xf32>
    %cst_6 = arith.constant 0.000000e+00 : f32
    %9 = vector.broadcast %cst_6 : f32 to vector<16x16xf32>
    %c0 = arith.constant 0 : index
    %c0_7 = arith.constant 0 : index
    %10 = arith.index_cast %1 : i32 to index
    %c0_8 = arith.constant 0 : index
    %11 = vector.load %arg2[%c0, %c0_7, %10, %c0_8] : memref<1x4x18x18xf32, #tpu.memory_space<vmem>>, vector<1x1x18x18xf32>
    %12 = vector.shape_cast %11 : vector<1x1x18x18xf32> to vector<18x18xf32>
    %cst_9 = arith.constant 0.000000e+00 : f32
    %13 = vector.broadcast %cst_9 : f32 to vector<16x16xf32>
    %14 = vector.extract_strided_slice %12 {offsets = [0, 0], sizes = [18, 16], strides = [1, 1]} : vector<18x18xf32> to vector<18x16xf32>
    %15 = vector.extract_strided_slice %14 {offsets = [0, 0], sizes = [16, 16], strides = [1, 1]} : vector<18x16xf32> to vector<16x16xf32>
    %c0_10 = arith.constant 0 : index
    %c0_11 = arith.constant 0 : index
    %16 = memref.load %arg3[%c0_10, %c0_11] : memref<4x9xf32, #tpu.memory_space<smem>>
    %17 = vector.broadcast %16 : f32 to vector<16x16xf32>
    %18 = arith.mulf %15, %17 : vector<16x16xf32>
    %19 = arith.addf %13, %18 : vector<16x16xf32>
    %20 = vector.extract_strided_slice %14 {offsets = [1, 0], sizes = [16, 16], strides = [1, 1]} : vector<18x16xf32> to vector<16x16xf32>
    %c0_12 = arith.constant 0 : index
    %c3 = arith.constant 3 : index
    %21 = memref.load %arg3[%c0_12, %c3] : memref<4x9xf32, #tpu.memory_space<smem>>
    %22 = vector.broadcast %21 : f32 to vector<16x16xf32>
    %23 = arith.mulf %20, %22 : vector<16x16xf32>
    %24 = arith.addf %19, %23 : vector<16x16xf32>
    %25 = vector.extract_strided_slice %14 {offsets = [2, 0], sizes = [16, 16], strides = [1, 1]} : vector<18x16xf32> to vector<16x16xf32>
    %c0_13 = arith.constant 0 : index
    %c6 = arith.constant 6 : index
    %26 = memref.load %arg3[%c0_13, %c6] : memref<4x9xf32, #tpu.memory_space<smem>>
    %27 = vector.broadcast %26 : f32 to vector<16x16xf32>
    %28 = arith.mulf %25, %27 : vector<16x16xf32>
    %29 = arith.addf %24, %28 : vector<16x16xf32>
    %30 = vector.extract_strided_slice %12 {offsets = [0, 1], sizes = [18, 16], strides = [1, 1]} : vector<18x18xf32> to vector<18x16xf32>
    %31 = vector.extract_strided_slice %30 {offsets = [0, 0], sizes = [16, 16], strides = [1, 1]} : vector<18x16xf32> to vector<16x16xf32>
    %c0_14 = arith.constant 0 : index
    %c1 = arith.constant 1 : index
    %32 = memref.load %arg3[%c0_14, %c1] : memref<4x9xf32, #tpu.memory_space<smem>>
    %33 = vector.broadcast %32 : f32 to vector<16x16xf32>
    %34 = arith.mulf %31, %33 : vector<16x16xf32>
    %35 = arith.addf %29, %34 : vector<16x16xf32>
    %36 = vector.extract_strided_slice %30 {offsets = [1, 0], sizes = [16, 16], strides = [1, 1]} : vector<18x16xf32> to vector<16x16xf32>
    %c0_15 = arith.constant 0 : index
    %c4 = arith.constant 4 : index
    %37 = memref.load %arg3[%c0_15, %c4] : memref<4x9xf32, #tpu.memory_space<smem>>
    %38 = vector.broadcast %37 : f32 to vector<16x16xf32>
    %39 = arith.mulf %36, %38 : vector<16x16xf32>
    %40 = arith.addf %35, %39 : vector<16x16xf32>
    %41 = vector.extract_strided_slice %30 {offsets = [2, 0], sizes = [16, 16], strides = [1, 1]} : vector<18x16xf32> to vector<16x16xf32>
    %c0_16 = arith.constant 0 : index
    %c7 = arith.constant 7 : index
    %42 = memref.load %arg3[%c0_16, %c7] : memref<4x9xf32, #tpu.memory_space<smem>>
    %43 = vector.broadcast %42 : f32 to vector<16x16xf32>
    %44 = arith.mulf %41, %43 : vector<16x16xf32>
    %45 = arith.addf %40, %44 : vector<16x16xf32>
    %46 = vector.extract_strided_slice %12 {offsets = [0, 2], sizes = [18, 16], strides = [1, 1]} : vector<18x18xf32> to vector<18x16xf32>
    %47 = vector.extract_strided_slice %46 {offsets = [0, 0], sizes = [16, 16], strides = [1, 1]} : vector<18x16xf32> to vector<16x16xf32>
    %c0_17 = arith.constant 0 : index
    %c2 = arith.constant 2 : index
    %48 = memref.load %arg3[%c0_17, %c2] : memref<4x9xf32, #tpu.memory_space<smem>>
    %49 = vector.broadcast %48 : f32 to vector<16x16xf32>
    %50 = arith.mulf %47, %49 : vector<16x16xf32>
    %51 = arith.addf %45, %50 : vector<16x16xf32>
    %52 = vector.extract_strided_slice %46 {offsets = [1, 0], sizes = [16, 16], strides = [1, 1]} : vector<18x16xf32> to vector<16x16xf32>
    %c0_18 = arith.constant 0 : index
    %c5 = arith.constant 5 : index
    %53 = memref.load %arg3[%c0_18, %c5] : memref<4x9xf32, #tpu.memory_space<smem>>
    %54 = vector.broadcast %53 : f32 to vector<16x16xf32>
    %55 = arith.mulf %52, %54 : vector<16x16xf32>
    %56 = arith.addf %51, %55 : vector<16x16xf32>
    %57 = vector.extract_strided_slice %46 {offsets = [2, 0], sizes = [16, 16], strides = [1, 1]} : vector<18x16xf32> to vector<16x16xf32>
    %c0_19 = arith.constant 0 : index
    %c8 = arith.constant 8 : index
    %58 = memref.load %arg3[%c0_19, %c8] : memref<4x9xf32, #tpu.memory_space<smem>>
    %59 = vector.broadcast %58 : f32 to vector<16x16xf32>
    %60 = arith.mulf %57, %59 : vector<16x16xf32>
    %61 = arith.addf %56, %60 : vector<16x16xf32>
    %c0_20 = arith.constant 0 : index
    %62 = memref.load %arg4[%c0_20] : memref<4xf32, #tpu.memory_space<smem>>
    %63 = vector.broadcast %62 : f32 to vector<16x16xf32>
    %64 = arith.addf %61, %63 : vector<16x16xf32>
    %cst_21 = arith.constant 0.000000e+00 : f32
    %65 = vector.broadcast %cst_21 : f32 to vector<16x16xf32>
    %66 = arith.maximumf %64, %65 : vector<16x16xf32>
    %c0_22 = arith.constant 0 : index
    %c0_23 = arith.constant 0 : index
    %67 = memref.load %arg5[%c0_22, %c0_23] : memref<4x8xf32, #tpu.memory_space<smem>>
    %68 = vector.broadcast %67 : f32 to vector<16x16xf32>
    %69 = arith.mulf %66, %68 : vector<16x16xf32>
    %70 = arith.addf %2, %69 : vector<16x16xf32>
    %c0_24 = arith.constant 0 : index
    %c1_25 = arith.constant 1 : index
    %71 = memref.load %arg5[%c0_24, %c1_25] : memref<4x8xf32, #tpu.memory_space<smem>>
    %72 = vector.broadcast %71 : f32 to vector<16x16xf32>
    %73 = arith.mulf %66, %72 : vector<16x16xf32>
    %74 = arith.addf %3, %73 : vector<16x16xf32>
    %c0_26 = arith.constant 0 : index
    %c2_27 = arith.constant 2 : index
    %75 = memref.load %arg5[%c0_26, %c2_27] : memref<4x8xf32, #tpu.memory_space<smem>>
    %76 = vector.broadcast %75 : f32 to vector<16x16xf32>
    %77 = arith.mulf %66, %76 : vector<16x16xf32>
    %78 = arith.addf %4, %77 : vector<16x16xf32>
    %c0_28 = arith.constant 0 : index
    %c3_29 = arith.constant 3 : index
    %79 = memref.load %arg5[%c0_28, %c3_29] : memref<4x8xf32, #tpu.memory_space<smem>>
    %80 = vector.broadcast %79 : f32 to vector<16x16xf32>
    %81 = arith.mulf %66, %80 : vector<16x16xf32>
    %82 = arith.addf %5, %81 : vector<16x16xf32>
    %c0_30 = arith.constant 0 : index
    %c4_31 = arith.constant 4 : index
    %83 = memref.load %arg5[%c0_30, %c4_31] : memref<4x8xf32, #tpu.memory_space<smem>>
    %84 = vector.broadcast %83 : f32 to vector<16x16xf32>
    %85 = arith.mulf %66, %84 : vector<16x16xf32>
    %86 = arith.addf %6, %85 : vector<16x16xf32>
    %c0_32 = arith.constant 0 : index
    %c5_33 = arith.constant 5 : index
    %87 = memref.load %arg5[%c0_32, %c5_33] : memref<4x8xf32, #tpu.memory_space<smem>>
    %88 = vector.broadcast %87 : f32 to vector<16x16xf32>
    %89 = arith.mulf %66, %88 : vector<16x16xf32>
    %90 = arith.addf %7, %89 : vector<16x16xf32>
    %c0_34 = arith.constant 0 : index
    %c6_35 = arith.constant 6 : index
    %91 = memref.load %arg5[%c0_34, %c6_35] : memref<4x8xf32, #tpu.memory_space<smem>>
    %92 = vector.broadcast %91 : f32 to vector<16x16xf32>
    %93 = arith.mulf %66, %92 : vector<16x16xf32>
    %94 = arith.addf %8, %93 : vector<16x16xf32>
    %c0_36 = arith.constant 0 : index
    %c7_37 = arith.constant 7 : index
    %95 = memref.load %arg5[%c0_36, %c7_37] : memref<4x8xf32, #tpu.memory_space<smem>>
    %96 = vector.broadcast %95 : f32 to vector<16x16xf32>
    %97 = arith.mulf %66, %96 : vector<16x16xf32>
    %98 = arith.addf %9, %97 : vector<16x16xf32>
    %c0_38 = arith.constant 0 : index
    %c1_39 = arith.constant 1 : index
    %99 = arith.index_cast %1 : i32 to index
    %c0_40 = arith.constant 0 : index
    %100 = vector.load %arg2[%c0_38, %c1_39, %99, %c0_40] : memref<1x4x18x18xf32, #tpu.memory_space<vmem>>, vector<1x1x18x18xf32>
    %101 = vector.shape_cast %100 : vector<1x1x18x18xf32> to vector<18x18xf32>
    %cst_41 = arith.constant 0.000000e+00 : f32
    %102 = vector.broadcast %cst_41 : f32 to vector<16x16xf32>
    %103 = vector.extract_strided_slice %101 {offsets = [0, 0], sizes = [18, 16], strides = [1, 1]} : vector<18x18xf32> to vector<18x16xf32>
    %104 = vector.extract_strided_slice %103 {offsets = [0, 0], sizes = [16, 16], strides = [1, 1]} : vector<18x16xf32> to vector<16x16xf32>
    %c1_42 = arith.constant 1 : index
    %c0_43 = arith.constant 0 : index
    %105 = memref.load %arg3[%c1_42, %c0_43] : memref<4x9xf32, #tpu.memory_space<smem>>
    %106 = vector.broadcast %105 : f32 to vector<16x16xf32>
    %107 = arith.mulf %104, %106 : vector<16x16xf32>
    %108 = arith.addf %102, %107 : vector<16x16xf32>
    %109 = vector.extract_strided_slice %103 {offsets = [1, 0], sizes = [16, 16], strides = [1, 1]} : vector<18x16xf32> to vector<16x16xf32>
    %c1_44 = arith.constant 1 : index
    %c3_45 = arith.constant 3 : index
    %110 = memref.load %arg3[%c1_44, %c3_45] : memref<4x9xf32, #tpu.memory_space<smem>>
    %111 = vector.broadcast %110 : f32 to vector<16x16xf32>
    %112 = arith.mulf %109, %111 : vector<16x16xf32>
    %113 = arith.addf %108, %112 : vector<16x16xf32>
    %114 = vector.extract_strided_slice %103 {offsets = [2, 0], sizes = [16, 16], strides = [1, 1]} : vector<18x16xf32> to vector<16x16xf32>
    %c1_46 = arith.constant 1 : index
    %c6_47 = arith.constant 6 : index
    %115 = memref.load %arg3[%c1_46, %c6_47] : memref<4x9xf32, #tpu.memory_space<smem>>
    %116 = vector.broadcast %115 : f32 to vector<16x16xf32>
    %117 = arith.mulf %114, %116 : vector<16x16xf32>
    %118 = arith.addf %113, %117 : vector<16x16xf32>
    %119 = vector.extract_strided_slice %101 {offsets = [0, 1], sizes = [18, 16], strides = [1, 1]} : vector<18x18xf32> to vector<18x16xf32>
    %120 = vector.extract_strided_slice %119 {offsets = [0, 0], sizes = [16, 16], strides = [1, 1]} : vector<18x16xf32> to vector<16x16xf32>
    %c1_48 = arith.constant 1 : index
    %c1_49 = arith.constant 1 : index
    %121 = memref.load %arg3[%c1_48, %c1_49] : memref<4x9xf32, #tpu.memory_space<smem>>
    %122 = vector.broadcast %121 : f32 to vector<16x16xf32>
    %123 = arith.mulf %120, %122 : vector<16x16xf32>
    %124 = arith.addf %118, %123 : vector<16x16xf32>
    %125 = vector.extract_strided_slice %119 {offsets = [1, 0], sizes = [16, 16], strides = [1, 1]} : vector<18x16xf32> to vector<16x16xf32>
    %c1_50 = arith.constant 1 : index
    %c4_51 = arith.constant 4 : index
    %126 = memref.load %arg3[%c1_50, %c4_51] : memref<4x9xf32, #tpu.memory_space<smem>>
    %127 = vector.broadcast %126 : f32 to vector<16x16xf32>
    %128 = arith.mulf %125, %127 : vector<16x16xf32>
    %129 = arith.addf %124, %128 : vector<16x16xf32>
    %130 = vector.extract_strided_slice %119 {offsets = [2, 0], sizes = [16, 16], strides = [1, 1]} : vector<18x16xf32> to vector<16x16xf32>
    %c1_52 = arith.constant 1 : index
    %c7_53 = arith.constant 7 : index
    %131 = memref.load %arg3[%c1_52, %c7_53] : memref<4x9xf32, #tpu.memory_space<smem>>
    %132 = vector.broadcast %131 : f32 to vector<16x16xf32>
    %133 = arith.mulf %130, %132 : vector<16x16xf32>
    %134 = arith.addf %129, %133 : vector<16x16xf32>
    %135 = vector.extract_strided_slice %101 {offsets = [0, 2], sizes = [18, 16], strides = [1, 1]} : vector<18x18xf32> to vector<18x16xf32>
    %136 = vector.extract_strided_slice %135 {offsets = [0, 0], sizes = [16, 16], strides = [1, 1]} : vector<18x16xf32> to vector<16x16xf32>
    %c1_54 = arith.constant 1 : index
    %c2_55 = arith.constant 2 : index
    %137 = memref.load %arg3[%c1_54, %c2_55] : memref<4x9xf32, #tpu.memory_space<smem>>
    %138 = vector.broadcast %137 : f32 to vector<16x16xf32>
    %139 = arith.mulf %136, %138 : vector<16x16xf32>
    %140 = arith.addf %134, %139 : vector<16x16xf32>
    %141 = vector.extract_strided_slice %135 {offsets = [1, 0], sizes = [16, 16], strides = [1, 1]} : vector<18x16xf32> to vector<16x16xf32>
    %c1_56 = arith.constant 1 : index
    %c5_57 = arith.constant 5 : index
    %142 = memref.load %arg3[%c1_56, %c5_57] : memref<4x9xf32, #tpu.memory_space<smem>>
    %143 = vector.broadcast %142 : f32 to vector<16x16xf32>
    %144 = arith.mulf %141, %143 : vector<16x16xf32>
    %145 = arith.addf %140, %144 : vector<16x16xf32>
    %146 = vector.extract_strided_slice %135 {offsets = [2, 0], sizes = [16, 16], strides = [1, 1]} : vector<18x16xf32> to vector<16x16xf32>
    %c1_58 = arith.constant 1 : index
    %c8_59 = arith.constant 8 : index
    %147 = memref.load %arg3[%c1_58, %c8_59] : memref<4x9xf32, #tpu.memory_space<smem>>
    %148 = vector.broadcast %147 : f32 to vector<16x16xf32>
    %149 = arith.mulf %146, %148 : vector<16x16xf32>
    %150 = arith.addf %145, %149 : vector<16x16xf32>
    %c1_60 = arith.constant 1 : index
    %151 = memref.load %arg4[%c1_60] : memref<4xf32, #tpu.memory_space<smem>>
    %152 = vector.broadcast %151 : f32 to vector<16x16xf32>
    %153 = arith.addf %150, %152 : vector<16x16xf32>
    %cst_61 = arith.constant 0.000000e+00 : f32
    %154 = vector.broadcast %cst_61 : f32 to vector<16x16xf32>
    %155 = arith.maximumf %153, %154 : vector<16x16xf32>
    %c1_62 = arith.constant 1 : index
    %c0_63 = arith.constant 0 : index
    %156 = memref.load %arg5[%c1_62, %c0_63] : memref<4x8xf32, #tpu.memory_space<smem>>
    %157 = vector.broadcast %156 : f32 to vector<16x16xf32>
    %158 = arith.mulf %155, %157 : vector<16x16xf32>
    %159 = arith.addf %70, %158 : vector<16x16xf32>
    %c1_64 = arith.constant 1 : index
    %c1_65 = arith.constant 1 : index
    %160 = memref.load %arg5[%c1_64, %c1_65] : memref<4x8xf32, #tpu.memory_space<smem>>
    %161 = vector.broadcast %160 : f32 to vector<16x16xf32>
    %162 = arith.mulf %155, %161 : vector<16x16xf32>
    %163 = arith.addf %74, %162 : vector<16x16xf32>
    %c1_66 = arith.constant 1 : index
    %c2_67 = arith.constant 2 : index
    %164 = memref.load %arg5[%c1_66, %c2_67] : memref<4x8xf32, #tpu.memory_space<smem>>
    %165 = vector.broadcast %164 : f32 to vector<16x16xf32>
    %166 = arith.mulf %155, %165 : vector<16x16xf32>
    %167 = arith.addf %78, %166 : vector<16x16xf32>
    %c1_68 = arith.constant 1 : index
    %c3_69 = arith.constant 3 : index
    %168 = memref.load %arg5[%c1_68, %c3_69] : memref<4x8xf32, #tpu.memory_space<smem>>
    %169 = vector.broadcast %168 : f32 to vector<16x16xf32>
    %170 = arith.mulf %155, %169 : vector<16x16xf32>
    %171 = arith.addf %82, %170 : vector<16x16xf32>
    %c1_70 = arith.constant 1 : index
    %c4_71 = arith.constant 4 : index
    %172 = memref.load %arg5[%c1_70, %c4_71] : memref<4x8xf32, #tpu.memory_space<smem>>
    %173 = vector.broadcast %172 : f32 to vector<16x16xf32>
    %174 = arith.mulf %155, %173 : vector<16x16xf32>
    %175 = arith.addf %86, %174 : vector<16x16xf32>
    %c1_72 = arith.constant 1 : index
    %c5_73 = arith.constant 5 : index
    %176 = memref.load %arg5[%c1_72, %c5_73] : memref<4x8xf32, #tpu.memory_space<smem>>
    %177 = vector.broadcast %176 : f32 to vector<16x16xf32>
    %178 = arith.mulf %155, %177 : vector<16x16xf32>
    %179 = arith.addf %90, %178 : vector<16x16xf32>
    %c1_74 = arith.constant 1 : index
    %c6_75 = arith.constant 6 : index
    %180 = memref.load %arg5[%c1_74, %c6_75] : memref<4x8xf32, #tpu.memory_space<smem>>
    %181 = vector.broadcast %180 : f32 to vector<16x16xf32>
    %182 = arith.mulf %155, %181 : vector<16x16xf32>
    %183 = arith.addf %94, %182 : vector<16x16xf32>
    %c1_76 = arith.constant 1 : index
    %c7_77 = arith.constant 7 : index
    %184 = memref.load %arg5[%c1_76, %c7_77] : memref<4x8xf32, #tpu.memory_space<smem>>
    %185 = vector.broadcast %184 : f32 to vector<16x16xf32>
    %186 = arith.mulf %155, %185 : vector<16x16xf32>
    %187 = arith.addf %98, %186 : vector<16x16xf32>
    %c0_78 = arith.constant 0 : index
    %c2_79 = arith.constant 2 : index
    %188 = arith.index_cast %1 : i32 to index
    %c0_80 = arith.constant 0 : index
    %189 = vector.load %arg2[%c0_78, %c2_79, %188, %c0_80] : memref<1x4x18x18xf32, #tpu.memory_space<vmem>>, vector<1x1x18x18xf32>
    %190 = vector.shape_cast %189 : vector<1x1x18x18xf32> to vector<18x18xf32>
    %cst_81 = arith.constant 0.000000e+00 : f32
    %191 = vector.broadcast %cst_81 : f32 to vector<16x16xf32>
    %192 = vector.extract_strided_slice %190 {offsets = [0, 0], sizes = [18, 16], strides = [1, 1]} : vector<18x18xf32> to vector<18x16xf32>
    %193 = vector.extract_strided_slice %192 {offsets = [0, 0], sizes = [16, 16], strides = [1, 1]} : vector<18x16xf32> to vector<16x16xf32>
    %c2_82 = arith.constant 2 : index
    %c0_83 = arith.constant 0 : index
    %194 = memref.load %arg3[%c2_82, %c0_83] : memref<4x9xf32, #tpu.memory_space<smem>>
    %195 = vector.broadcast %194 : f32 to vector<16x16xf32>
    %196 = arith.mulf %193, %195 : vector<16x16xf32>
    %197 = arith.addf %191, %196 : vector<16x16xf32>
    %198 = vector.extract_strided_slice %192 {offsets = [1, 0], sizes = [16, 16], strides = [1, 1]} : vector<18x16xf32> to vector<16x16xf32>
    %c2_84 = arith.constant 2 : index
    %c3_85 = arith.constant 3 : index
    %199 = memref.load %arg3[%c2_84, %c3_85] : memref<4x9xf32, #tpu.memory_space<smem>>
    %200 = vector.broadcast %199 : f32 to vector<16x16xf32>
    %201 = arith.mulf %198, %200 : vector<16x16xf32>
    %202 = arith.addf %197, %201 : vector<16x16xf32>
    %203 = vector.extract_strided_slice %192 {offsets = [2, 0], sizes = [16, 16], strides = [1, 1]} : vector<18x16xf32> to vector<16x16xf32>
    %c2_86 = arith.constant 2 : index
    %c6_87 = arith.constant 6 : index
    %204 = memref.load %arg3[%c2_86, %c6_87] : memref<4x9xf32, #tpu.memory_space<smem>>
    %205 = vector.broadcast %204 : f32 to vector<16x16xf32>
    %206 = arith.mulf %203, %205 : vector<16x16xf32>
    %207 = arith.addf %202, %206 : vector<16x16xf32>
    %208 = vector.extract_strided_slice %190 {offsets = [0, 1], sizes = [18, 16], strides = [1, 1]} : vector<18x18xf32> to vector<18x16xf32>
    %209 = vector.extract_strided_slice %208 {offsets = [0, 0], sizes = [16, 16], strides = [1, 1]} : vector<18x16xf32> to vector<16x16xf32>
    %c2_88 = arith.constant 2 : index
    %c1_89 = arith.constant 1 : index
    %210 = memref.load %arg3[%c2_88, %c1_89] : memref<4x9xf32, #tpu.memory_space<smem>>
    %211 = vector.broadcast %210 : f32 to vector<16x16xf32>
    %212 = arith.mulf %209, %211 : vector<16x16xf32>
    %213 = arith.addf %207, %212 : vector<16x16xf32>
    %214 = vector.extract_strided_slice %208 {offsets = [1, 0], sizes = [16, 16], strides = [1, 1]} : vector<18x16xf32> to vector<16x16xf32>
    %c2_90 = arith.constant 2 : index
    %c4_91 = arith.constant 4 : index
    %215 = memref.load %arg3[%c2_90, %c4_91] : memref<4x9xf32, #tpu.memory_space<smem>>
    %216 = vector.broadcast %215 : f32 to vector<16x16xf32>
    %217 = arith.mulf %214, %216 : vector<16x16xf32>
    %218 = arith.addf %213, %217 : vector<16x16xf32>
    %219 = vector.extract_strided_slice %208 {offsets = [2, 0], sizes = [16, 16], strides = [1, 1]} : vector<18x16xf32> to vector<16x16xf32>
    %c2_92 = arith.constant 2 : index
    %c7_93 = arith.constant 7 : index
    %220 = memref.load %arg3[%c2_92, %c7_93] : memref<4x9xf32, #tpu.memory_space<smem>>
    %221 = vector.broadcast %220 : f32 to vector<16x16xf32>
    %222 = arith.mulf %219, %221 : vector<16x16xf32>
    %223 = arith.addf %218, %222 : vector<16x16xf32>
    %224 = vector.extract_strided_slice %190 {offsets = [0, 2], sizes = [18, 16], strides = [1, 1]} : vector<18x18xf32> to vector<18x16xf32>
    %225 = vector.extract_strided_slice %224 {offsets = [0, 0], sizes = [16, 16], strides = [1, 1]} : vector<18x16xf32> to vector<16x16xf32>
    %c2_94 = arith.constant 2 : index
    %c2_95 = arith.constant 2 : index
    %226 = memref.load %arg3[%c2_94, %c2_95] : memref<4x9xf32, #tpu.memory_space<smem>>
    %227 = vector.broadcast %226 : f32 to vector<16x16xf32>
    %228 = arith.mulf %225, %227 : vector<16x16xf32>
    %229 = arith.addf %223, %228 : vector<16x16xf32>
    %230 = vector.extract_strided_slice %224 {offsets = [1, 0], sizes = [16, 16], strides = [1, 1]} : vector<18x16xf32> to vector<16x16xf32>
    %c2_96 = arith.constant 2 : index
    %c5_97 = arith.constant 5 : index
    %231 = memref.load %arg3[%c2_96, %c5_97] : memref<4x9xf32, #tpu.memory_space<smem>>
    %232 = vector.broadcast %231 : f32 to vector<16x16xf32>
    %233 = arith.mulf %230, %232 : vector<16x16xf32>
    %234 = arith.addf %229, %233 : vector<16x16xf32>
    %235 = vector.extract_strided_slice %224 {offsets = [2, 0], sizes = [16, 16], strides = [1, 1]} : vector<18x16xf32> to vector<16x16xf32>
    %c2_98 = arith.constant 2 : index
    %c8_99 = arith.constant 8 : index
    %236 = memref.load %arg3[%c2_98, %c8_99] : memref<4x9xf32, #tpu.memory_space<smem>>
    %237 = vector.broadcast %236 : f32 to vector<16x16xf32>
    %238 = arith.mulf %235, %237 : vector<16x16xf32>
    %239 = arith.addf %234, %238 : vector<16x16xf32>
    %c2_100 = arith.constant 2 : index
    %240 = memref.load %arg4[%c2_100] : memref<4xf32, #tpu.memory_space<smem>>
    %241 = vector.broadcast %240 : f32 to vector<16x16xf32>
    %242 = arith.addf %239, %241 : vector<16x16xf32>
    %cst_101 = arith.constant 0.000000e+00 : f32
    %243 = vector.broadcast %cst_101 : f32 to vector<16x16xf32>
    %244 = arith.maximumf %242, %243 : vector<16x16xf32>
    %c2_102 = arith.constant 2 : index
    %c0_103 = arith.constant 0 : index
    %245 = memref.load %arg5[%c2_102, %c0_103] : memref<4x8xf32, #tpu.memory_space<smem>>
    %246 = vector.broadcast %245 : f32 to vector<16x16xf32>
    %247 = arith.mulf %244, %246 : vector<16x16xf32>
    %248 = arith.addf %159, %247 : vector<16x16xf32>
    %c2_104 = arith.constant 2 : index
    %c1_105 = arith.constant 1 : index
    %249 = memref.load %arg5[%c2_104, %c1_105] : memref<4x8xf32, #tpu.memory_space<smem>>
    %250 = vector.broadcast %249 : f32 to vector<16x16xf32>
    %251 = arith.mulf %244, %250 : vector<16x16xf32>
    %252 = arith.addf %163, %251 : vector<16x16xf32>
    %c2_106 = arith.constant 2 : index
    %c2_107 = arith.constant 2 : index
    %253 = memref.load %arg5[%c2_106, %c2_107] : memref<4x8xf32, #tpu.memory_space<smem>>
    %254 = vector.broadcast %253 : f32 to vector<16x16xf32>
    %255 = arith.mulf %244, %254 : vector<16x16xf32>
    %256 = arith.addf %167, %255 : vector<16x16xf32>
    %c2_108 = arith.constant 2 : index
    %c3_109 = arith.constant 3 : index
    %257 = memref.load %arg5[%c2_108, %c3_109] : memref<4x8xf32, #tpu.memory_space<smem>>
    %258 = vector.broadcast %257 : f32 to vector<16x16xf32>
    %259 = arith.mulf %244, %258 : vector<16x16xf32>
    %260 = arith.addf %171, %259 : vector<16x16xf32>
    %c2_110 = arith.constant 2 : index
    %c4_111 = arith.constant 4 : index
    %261 = memref.load %arg5[%c2_110, %c4_111] : memref<4x8xf32, #tpu.memory_space<smem>>
    %262 = vector.broadcast %261 : f32 to vector<16x16xf32>
    %263 = arith.mulf %244, %262 : vector<16x16xf32>
    %264 = arith.addf %175, %263 : vector<16x16xf32>
    %c2_112 = arith.constant 2 : index
    %c5_113 = arith.constant 5 : index
    %265 = memref.load %arg5[%c2_112, %c5_113] : memref<4x8xf32, #tpu.memory_space<smem>>
    %266 = vector.broadcast %265 : f32 to vector<16x16xf32>
    %267 = arith.mulf %244, %266 : vector<16x16xf32>
    %268 = arith.addf %179, %267 : vector<16x16xf32>
    %c2_114 = arith.constant 2 : index
    %c6_115 = arith.constant 6 : index
    %269 = memref.load %arg5[%c2_114, %c6_115] : memref<4x8xf32, #tpu.memory_space<smem>>
    %270 = vector.broadcast %269 : f32 to vector<16x16xf32>
    %271 = arith.mulf %244, %270 : vector<16x16xf32>
    %272 = arith.addf %183, %271 : vector<16x16xf32>
    %c2_116 = arith.constant 2 : index
    %c7_117 = arith.constant 7 : index
    %273 = memref.load %arg5[%c2_116, %c7_117] : memref<4x8xf32, #tpu.memory_space<smem>>
    %274 = vector.broadcast %273 : f32 to vector<16x16xf32>
    %275 = arith.mulf %244, %274 : vector<16x16xf32>
    %276 = arith.addf %187, %275 : vector<16x16xf32>
    %c0_118 = arith.constant 0 : index
    %c3_119 = arith.constant 3 : index
    %277 = arith.index_cast %1 : i32 to index
    %c0_120 = arith.constant 0 : index
    %278 = vector.load %arg2[%c0_118, %c3_119, %277, %c0_120] : memref<1x4x18x18xf32, #tpu.memory_space<vmem>>, vector<1x1x18x18xf32>
    %279 = vector.shape_cast %278 : vector<1x1x18x18xf32> to vector<18x18xf32>
    %cst_121 = arith.constant 0.000000e+00 : f32
    %280 = vector.broadcast %cst_121 : f32 to vector<16x16xf32>
    %281 = vector.extract_strided_slice %279 {offsets = [0, 0], sizes = [18, 16], strides = [1, 1]} : vector<18x18xf32> to vector<18x16xf32>
    %282 = vector.extract_strided_slice %281 {offsets = [0, 0], sizes = [16, 16], strides = [1, 1]} : vector<18x16xf32> to vector<16x16xf32>
    %c3_122 = arith.constant 3 : index
    %c0_123 = arith.constant 0 : index
    %283 = memref.load %arg3[%c3_122, %c0_123] : memref<4x9xf32, #tpu.memory_space<smem>>
    %284 = vector.broadcast %283 : f32 to vector<16x16xf32>
    %285 = arith.mulf %282, %284 : vector<16x16xf32>
    %286 = arith.addf %280, %285 : vector<16x16xf32>
    %287 = vector.extract_strided_slice %281 {offsets = [1, 0], sizes = [16, 16], strides = [1, 1]} : vector<18x16xf32> to vector<16x16xf32>
    %c3_124 = arith.constant 3 : index
    %c3_125 = arith.constant 3 : index
    %288 = memref.load %arg3[%c3_124, %c3_125] : memref<4x9xf32, #tpu.memory_space<smem>>
    %289 = vector.broadcast %288 : f32 to vector<16x16xf32>
    %290 = arith.mulf %287, %289 : vector<16x16xf32>
    %291 = arith.addf %286, %290 : vector<16x16xf32>
    %292 = vector.extract_strided_slice %281 {offsets = [2, 0], sizes = [16, 16], strides = [1, 1]} : vector<18x16xf32> to vector<16x16xf32>
    %c3_126 = arith.constant 3 : index
    %c6_127 = arith.constant 6 : index
    %293 = memref.load %arg3[%c3_126, %c6_127] : memref<4x9xf32, #tpu.memory_space<smem>>
    %294 = vector.broadcast %293 : f32 to vector<16x16xf32>
    %295 = arith.mulf %292, %294 : vector<16x16xf32>
    %296 = arith.addf %291, %295 : vector<16x16xf32>
    %297 = vector.extract_strided_slice %279 {offsets = [0, 1], sizes = [18, 16], strides = [1, 1]} : vector<18x18xf32> to vector<18x16xf32>
    %298 = vector.extract_strided_slice %297 {offsets = [0, 0], sizes = [16, 16], strides = [1, 1]} : vector<18x16xf32> to vector<16x16xf32>
    %c3_128 = arith.constant 3 : index
    %c1_129 = arith.constant 1 : index
    %299 = memref.load %arg3[%c3_128, %c1_129] : memref<4x9xf32, #tpu.memory_space<smem>>
    %300 = vector.broadcast %299 : f32 to vector<16x16xf32>
    %301 = arith.mulf %298, %300 : vector<16x16xf32>
    %302 = arith.addf %296, %301 : vector<16x16xf32>
    %303 = vector.extract_strided_slice %297 {offsets = [1, 0], sizes = [16, 16], strides = [1, 1]} : vector<18x16xf32> to vector<16x16xf32>
    %c3_130 = arith.constant 3 : index
    %c4_131 = arith.constant 4 : index
    %304 = memref.load %arg3[%c3_130, %c4_131] : memref<4x9xf32, #tpu.memory_space<smem>>
    %305 = vector.broadcast %304 : f32 to vector<16x16xf32>
    %306 = arith.mulf %303, %305 : vector<16x16xf32>
    %307 = arith.addf %302, %306 : vector<16x16xf32>
    %308 = vector.extract_strided_slice %297 {offsets = [2, 0], sizes = [16, 16], strides = [1, 1]} : vector<18x16xf32> to vector<16x16xf32>
    %c3_132 = arith.constant 3 : index
    %c7_133 = arith.constant 7 : index
    %309 = memref.load %arg3[%c3_132, %c7_133] : memref<4x9xf32, #tpu.memory_space<smem>>
    %310 = vector.broadcast %309 : f32 to vector<16x16xf32>
    %311 = arith.mulf %308, %310 : vector<16x16xf32>
    %312 = arith.addf %307, %311 : vector<16x16xf32>
    %313 = vector.extract_strided_slice %279 {offsets = [0, 2], sizes = [18, 16], strides = [1, 1]} : vector<18x18xf32> to vector<18x16xf32>
    %314 = vector.extract_strided_slice %313 {offsets = [0, 0], sizes = [16, 16], strides = [1, 1]} : vector<18x16xf32> to vector<16x16xf32>
    %c3_134 = arith.constant 3 : index
    %c2_135 = arith.constant 2 : index
    %315 = memref.load %arg3[%c3_134, %c2_135] : memref<4x9xf32, #tpu.memory_space<smem>>
    %316 = vector.broadcast %315 : f32 to vector<16x16xf32>
    %317 = arith.mulf %314, %316 : vector<16x16xf32>
    %318 = arith.addf %312, %317 : vector<16x16xf32>
    %319 = vector.extract_strided_slice %313 {offsets = [1, 0], sizes = [16, 16], strides = [1, 1]} : vector<18x16xf32> to vector<16x16xf32>
    %c3_136 = arith.constant 3 : index
    %c5_137 = arith.constant 5 : index
    %320 = memref.load %arg3[%c3_136, %c5_137] : memref<4x9xf32, #tpu.memory_space<smem>>
    %321 = vector.broadcast %320 : f32 to vector<16x16xf32>
    %322 = arith.mulf %319, %321 : vector<16x16xf32>
    %323 = arith.addf %318, %322 : vector<16x16xf32>
    %324 = vector.extract_strided_slice %313 {offsets = [2, 0], sizes = [16, 16], strides = [1, 1]} : vector<18x16xf32> to vector<16x16xf32>
    %c3_138 = arith.constant 3 : index
    %c8_139 = arith.constant 8 : index
    %325 = memref.load %arg3[%c3_138, %c8_139] : memref<4x9xf32, #tpu.memory_space<smem>>
    %326 = vector.broadcast %325 : f32 to vector<16x16xf32>
    %327 = arith.mulf %324, %326 : vector<16x16xf32>
    %328 = arith.addf %323, %327 : vector<16x16xf32>
    %c3_140 = arith.constant 3 : index
    %329 = memref.load %arg4[%c3_140] : memref<4xf32, #tpu.memory_space<smem>>
    %330 = vector.broadcast %329 : f32 to vector<16x16xf32>
    %331 = arith.addf %328, %330 : vector<16x16xf32>
    %cst_141 = arith.constant 0.000000e+00 : f32
    %332 = vector.broadcast %cst_141 : f32 to vector<16x16xf32>
    %333 = arith.maximumf %331, %332 : vector<16x16xf32>
    %c3_142 = arith.constant 3 : index
    %c0_143 = arith.constant 0 : index
    %334 = memref.load %arg5[%c3_142, %c0_143] : memref<4x8xf32, #tpu.memory_space<smem>>
    %335 = vector.broadcast %334 : f32 to vector<16x16xf32>
    %336 = arith.mulf %333, %335 : vector<16x16xf32>
    %337 = arith.addf %248, %336 : vector<16x16xf32>
    %c3_144 = arith.constant 3 : index
    %c1_145 = arith.constant 1 : index
    %338 = memref.load %arg5[%c3_144, %c1_145] : memref<4x8xf32, #tpu.memory_space<smem>>
    %339 = vector.broadcast %338 : f32 to vector<16x16xf32>
    %340 = arith.mulf %333, %339 : vector<16x16xf32>
    %341 = arith.addf %252, %340 : vector<16x16xf32>
    %c3_146 = arith.constant 3 : index
    %c2_147 = arith.constant 2 : index
    %342 = memref.load %arg5[%c3_146, %c2_147] : memref<4x8xf32, #tpu.memory_space<smem>>
    %343 = vector.broadcast %342 : f32 to vector<16x16xf32>
    %344 = arith.mulf %333, %343 : vector<16x16xf32>
    %345 = arith.addf %256, %344 : vector<16x16xf32>
    %c3_148 = arith.constant 3 : index
    %c3_149 = arith.constant 3 : index
    %346 = memref.load %arg5[%c3_148, %c3_149] : memref<4x8xf32, #tpu.memory_space<smem>>
    %347 = vector.broadcast %346 : f32 to vector<16x16xf32>
    %348 = arith.mulf %333, %347 : vector<16x16xf32>
    %349 = arith.addf %260, %348 : vector<16x16xf32>
    %c3_150 = arith.constant 3 : index
    %c4_151 = arith.constant 4 : index
    %350 = memref.load %arg5[%c3_150, %c4_151] : memref<4x8xf32, #tpu.memory_space<smem>>
    %351 = vector.broadcast %350 : f32 to vector<16x16xf32>
    %352 = arith.mulf %333, %351 : vector<16x16xf32>
    %353 = arith.addf %264, %352 : vector<16x16xf32>
    %c3_152 = arith.constant 3 : index
    %c5_153 = arith.constant 5 : index
    %354 = memref.load %arg5[%c3_152, %c5_153] : memref<4x8xf32, #tpu.memory_space<smem>>
    %355 = vector.broadcast %354 : f32 to vector<16x16xf32>
    %356 = arith.mulf %333, %355 : vector<16x16xf32>
    %357 = arith.addf %268, %356 : vector<16x16xf32>
    %c3_154 = arith.constant 3 : index
    %c6_155 = arith.constant 6 : index
    %358 = memref.load %arg5[%c3_154, %c6_155] : memref<4x8xf32, #tpu.memory_space<smem>>
    %359 = vector.broadcast %358 : f32 to vector<16x16xf32>
    %360 = arith.mulf %333, %359 : vector<16x16xf32>
    %361 = arith.addf %272, %360 : vector<16x16xf32>
    %c3_156 = arith.constant 3 : index
    %c7_157 = arith.constant 7 : index
    %362 = memref.load %arg5[%c3_156, %c7_157] : memref<4x8xf32, #tpu.memory_space<smem>>
    %363 = vector.broadcast %362 : f32 to vector<16x16xf32>
    %364 = arith.mulf %333, %363 : vector<16x16xf32>
    %365 = arith.addf %276, %364 : vector<16x16xf32>
    %c0_158 = arith.constant 0 : index
    %366 = memref.load %arg6[%c0_158] : memref<8xf32, #tpu.memory_space<smem>>
    %367 = vector.broadcast %366 : f32 to vector<16x16xf32>
    %368 = arith.addf %337, %367 : vector<16x16xf32>
    %cst_159 = arith.constant 0.000000e+00 : f32
    %369 = vector.broadcast %cst_159 : f32 to vector<16x16xf32>
    %370 = arith.maximumf %368, %369 : vector<16x16xf32>
    %c0_160 = arith.constant 0 : index
    %c0_161 = arith.constant 0 : index
    %c0_162 = arith.constant 0 : index
    %371 = vector.load %arg7[%c0_160, %c0_161, %c0_162] : memref<1x16x128xf32, #tpu.memory_space<vmem>>, vector<1x16x16xf32>
    %372 = vector.shape_cast %371 : vector<1x16x16xf32> to vector<16x16xf32>
    %373 = vector.shape_cast %370 : vector<16x16xf32> to vector<1x16x16xf32>
    tpu.vector_store %arg7[%c0_160, %c0_161, %c0_162], %373 {strides = array<i32>} : memref<1x16x128xf32, #tpu.memory_space<vmem>>, vector<1x16x16xf32>,
    %c1_163 = arith.constant 1 : index
    %374 = memref.load %arg6[%c1_163] : memref<8xf32, #tpu.memory_space<smem>>
    %375 = vector.broadcast %374 : f32 to vector<16x16xf32>
    %376 = arith.addf %341, %375 : vector<16x16xf32>
    %cst_164 = arith.constant 0.000000e+00 : f32
    %377 = vector.broadcast %cst_164 : f32 to vector<16x16xf32>
    %378 = arith.maximumf %376, %377 : vector<16x16xf32>
    %c0_165 = arith.constant 0 : index
    %c0_166 = arith.constant 0 : index
    %c16 = arith.constant 16 : index
    %379 = vector.load %arg7[%c0_165, %c0_166, %c16] : memref<1x16x128xf32, #tpu.memory_space<vmem>>, vector<1x16x16xf32>
    %380 = vector.shape_cast %379 : vector<1x16x16xf32> to vector<16x16xf32>
    %381 = vector.shape_cast %378 : vector<16x16xf32> to vector<1x16x16xf32>
    tpu.vector_store %arg7[%c0_165, %c0_166, %c16], %381 {strides = array<i32>} : memref<1x16x128xf32, #tpu.memory_space<vmem>>, vector<1x16x16xf32>,
    %c2_167 = arith.constant 2 : index
    %382 = memref.load %arg6[%c2_167] : memref<8xf32, #tpu.memory_space<smem>>
    %383 = vector.broadcast %382 : f32 to vector<16x16xf32>
    %384 = arith.addf %345, %383 : vector<16x16xf32>
    %cst_168 = arith.constant 0.000000e+00 : f32
    %385 = vector.broadcast %cst_168 : f32 to vector<16x16xf32>
    %386 = arith.maximumf %384, %385 : vector<16x16xf32>
    %c0_169 = arith.constant 0 : index
    %c0_170 = arith.constant 0 : index
    %c32 = arith.constant 32 : index
    %387 = vector.load %arg7[%c0_169, %c0_170, %c32] : memref<1x16x128xf32, #tpu.memory_space<vmem>>, vector<1x16x16xf32>
    %388 = vector.shape_cast %387 : vector<1x16x16xf32> to vector<16x16xf32>
    %389 = vector.shape_cast %386 : vector<16x16xf32> to vector<1x16x16xf32>
    tpu.vector_store %arg7[%c0_169, %c0_170, %c32], %389 {strides = array<i32>} : memref<1x16x128xf32, #tpu.memory_space<vmem>>, vector<1x16x16xf32>,
    %c3_171 = arith.constant 3 : index
    %390 = memref.load %arg6[%c3_171] : memref<8xf32, #tpu.memory_space<smem>>
    %391 = vector.broadcast %390 : f32 to vector<16x16xf32>
    %392 = arith.addf %349, %391 : vector<16x16xf32>
    %cst_172 = arith.constant 0.000000e+00 : f32
    %393 = vector.broadcast %cst_172 : f32 to vector<16x16xf32>
    %394 = arith.maximumf %392, %393 : vector<16x16xf32>
    %c0_173 = arith.constant 0 : index
    %c0_174 = arith.constant 0 : index
    %c48 = arith.constant 48 : index
    %395 = vector.load %arg7[%c0_173, %c0_174, %c48] : memref<1x16x128xf32, #tpu.memory_space<vmem>>, vector<1x16x16xf32>
    %396 = vector.shape_cast %395 : vector<1x16x16xf32> to vector<16x16xf32>
    %397 = vector.shape_cast %394 : vector<16x16xf32> to vector<1x16x16xf32>
    tpu.vector_store %arg7[%c0_173, %c0_174, %c48], %397 {strides = array<i32>} : memref<1x16x128xf32, #tpu.memory_space<vmem>>, vector<1x16x16xf32>,
    %c4_175 = arith.constant 4 : index
    %398 = memref.load %arg6[%c4_175] : memref<8xf32, #tpu.memory_space<smem>>
    %399 = vector.broadcast %398 : f32 to vector<16x16xf32>
    %400 = arith.addf %353, %399 : vector<16x16xf32>
    %cst_176 = arith.constant 0.000000e+00 : f32
    %401 = vector.broadcast %cst_176 : f32 to vector<16x16xf32>
    %402 = arith.maximumf %400, %401 : vector<16x16xf32>
    %c0_177 = arith.constant 0 : index
    %c0_178 = arith.constant 0 : index
    %c64 = arith.constant 64 : index
    %403 = vector.load %arg7[%c0_177, %c0_178, %c64] : memref<1x16x128xf32, #tpu.memory_space<vmem>>, vector<1x16x16xf32>
    %404 = vector.shape_cast %403 : vector<1x16x16xf32> to vector<16x16xf32>
    %405 = vector.shape_cast %402 : vector<16x16xf32> to vector<1x16x16xf32>
    tpu.vector_store %arg7[%c0_177, %c0_178, %c64], %405 {strides = array<i32>} : memref<1x16x128xf32, #tpu.memory_space<vmem>>, vector<1x16x16xf32>,
    %c5_179 = arith.constant 5 : index
    %406 = memref.load %arg6[%c5_179] : memref<8xf32, #tpu.memory_space<smem>>
    %407 = vector.broadcast %406 : f32 to vector<16x16xf32>
    %408 = arith.addf %357, %407 : vector<16x16xf32>
    %cst_180 = arith.constant 0.000000e+00 : f32
    %409 = vector.broadcast %cst_180 : f32 to vector<16x16xf32>
    %410 = arith.maximumf %408, %409 : vector<16x16xf32>
    %c0_181 = arith.constant 0 : index
    %c0_182 = arith.constant 0 : index
    %c80 = arith.constant 80 : index
    %411 = vector.load %arg7[%c0_181, %c0_182, %c80] : memref<1x16x128xf32, #tpu.memory_space<vmem>>, vector<1x16x16xf32>
    %412 = vector.shape_cast %411 : vector<1x16x16xf32> to vector<16x16xf32>
    %413 = vector.shape_cast %410 : vector<16x16xf32> to vector<1x16x16xf32>
    tpu.vector_store %arg7[%c0_181, %c0_182, %c80], %413 {strides = array<i32>} : memref<1x16x128xf32, #tpu.memory_space<vmem>>, vector<1x16x16xf32>,
    %c6_183 = arith.constant 6 : index
    %414 = memref.load %arg6[%c6_183] : memref<8xf32, #tpu.memory_space<smem>>
    %415 = vector.broadcast %414 : f32 to vector<16x16xf32>
    %416 = arith.addf %361, %415 : vector<16x16xf32>
    %cst_184 = arith.constant 0.000000e+00 : f32
    %417 = vector.broadcast %cst_184 : f32 to vector<16x16xf32>
    %418 = arith.maximumf %416, %417 : vector<16x16xf32>
    %c0_185 = arith.constant 0 : index
    %c0_186 = arith.constant 0 : index
    %c96 = arith.constant 96 : index
    %419 = vector.load %arg7[%c0_185, %c0_186, %c96] : memref<1x16x128xf32, #tpu.memory_space<vmem>>, vector<1x16x16xf32>
    %420 = vector.shape_cast %419 : vector<1x16x16xf32> to vector<16x16xf32>
    %421 = vector.shape_cast %418 : vector<16x16xf32> to vector<1x16x16xf32>
    tpu.vector_store %arg7[%c0_185, %c0_186, %c96], %421 {strides = array<i32>} : memref<1x16x128xf32, #tpu.memory_space<vmem>>, vector<1x16x16xf32>,
    %c7_187 = arith.constant 7 : index
    %422 = memref.load %arg6[%c7_187] : memref<8xf32, #tpu.memory_space<smem>>
    %423 = vector.broadcast %422 : f32 to vector<16x16xf32>
    %424 = arith.addf %365, %423 : vector<16x16xf32>
    %cst_188 = arith.constant 0.000000e+00 : f32
    %425 = vector.broadcast %cst_188 : f32 to vector<16x16xf32>
    %426 = arith.maximumf %424, %425 : vector<16x16xf32>
    %c0_189 = arith.constant 0 : index
    %c0_190 = arith.constant 0 : index
    %c112 = arith.constant 112 : index
    %427 = vector.load %arg7[%c0_189, %c0_190, %c112] : memref<1x16x128xf32, #tpu.memory_space<vmem>>, vector<1x16x16xf32>
    %428 = vector.shape_cast %427 : vector<1x16x16xf32> to vector<16x16xf32>
    %429 = vector.shape_cast %426 : vector<16x16xf32> to vector<1x16x16xf32>
    tpu.vector_store %arg7[%c0_189, %c0_190, %c112], %429 {strides = array<i32>} : memref<1x16x128xf32, #tpu.memory_space<vmem>>, vector<1x16x16xf32>,
    return
  }
  func.func @transform_0(%arg0: i32, %arg1: i32) -> (i32, i32, i32, i32) {
    %c0_i32 = arith.constant 0 : i32
    %c0_i32_0 = arith.constant 0 : i32
    %c0_i32_1 = arith.constant 0 : i32
    %c0_i32_2 = arith.constant 0 : i32
    return %arg0, %c0_i32, %c0_i32_0, %c0_i32_1 : i32, i32, i32, i32
  }
  func.func @transform_1(%arg0: i32, %arg1: i32) -> (i32, i32) {
    %c0_i32 = arith.constant 0 : i32
    %c0_i32_0 = arith.constant 0 : i32
    %c0_i32_1 = arith.constant 0 : i32
    return %c0_i32, %c0_i32_0 : i32, i32
  }
  func.func @transform_2(%arg0: i32, %arg1: i32) -> i32 {
    %c0_i32 = arith.constant 0 : i32
    %c0_i32_0 = arith.constant 0 : i32
    return %c0_i32 : i32
  }
  func.func @transform_3(%arg0: i32, %arg1: i32) -> (i32, i32) {
    %c0_i32 = arith.constant 0 : i32
    %c0_i32_0 = arith.constant 0 : i32
    %c0_i32_1 = arith.constant 0 : i32
    return %c0_i32, %c0_i32_0 : i32, i32
  }
  func.func @transform_4(%arg0: i32, %arg1: i32) -> i32 {
    %c0_i32 = arith.constant 0 : i32
    %c0_i32_0 = arith.constant 0 : i32
    return %c0_i32 : i32
  }
  func.func @transform_5(%arg0: i32, %arg1: i32) -> (i32, i32, i32) {
    %c0_i32 = arith.constant 0 : i32
    %c0_i32_0 = arith.constant 0 : i32
    return %arg0, %arg1, %c0_i32 : i32, i32, i32
  }
}

</mosaic_0001>

<bundles_post_ra>
// kernel: dsconv_forward.1
= control target key start
LH: loop header
LB: loop body
LE: loop exit
PB: predicated region body
PF: predicated region fallthrough
CT: control target
= control target key end

     0   :  { %s2678_s0 = inlined_call_operand.vmem [shape: f32[2,4,18,18], index: 0, kind: input, shape index: {}]   ;;  %s2679_s1 = inlined_call_operand.vmem [shape: f32[4,9], index: 1, kind: input, shape index: {}]   ;;  %s2680_s2 = inlined_call_operand.vmem [shape: f32[4], index: 2, kind: input, shape index: {}]   ;;  %s2681_s3 = inlined_call_operand.vmem [shape: f32[4,8], index: 3, kind: input, shape index: {}]   ;;  %s2682_s4 = inlined_call_operand.vmem [shape: f32[8], index: 4, kind: input, shape index: {}]   ;;  %s2683_s5 = inlined_call_operand.vmem [shape: f32[2,16,128], index: 5, kind: output, shape index: {}]  }
   0x1   :  { %2688 = sst [smem:[#allocation14_spill]] %s2678_s0 }
   0x2   :  { %2689 = sst [smem:[#allocation15_spill]] %s2679_s1 }
   0x3   :  { %2690 = sst [smem:[#allocation16_spill]] %s2680_s2 }
   0x4   :  { %2691 = sst [smem:[#allocation17_spill]] %s2681_s3 }
   0x5   :  { %2692 = sst [smem:[#allocation18_spill]] %s2682_s4 }
   0x6   :  { %10 = vsyncpa [#allocation3], 0 }
   0x7   :  { %11 = vsyncpa [#allocation5], 0 }
   0x8   :  { %12 = vsyncpa [#allocation8], 0  ;;  %s1725_s18 = smov 0   ;;  %s1727_s19 = smov 0  }
   0x9   :  { %s1729_s20 = smov 0  }
   0xa LB: > { %2693 = sst [smem:[#allocation12_spill]] %s1676_s19  ;;  %s1407_s24 = sadd.s32 4294967295, %s1680_s20   ;;  %s1680_s20 = sphi %s1729_s20, %s18_s20   ;;  %s1676_s19 = sphi %s1727_s19, %s2711_s19   ;;  %s1672_s18 = sphi %s1725_s18, %s2710_s18  }
   0xb   : > { %s2694_s2 = sld [smem:[#allocation16_spill]]  ;;  %p1409_p0 = scmp.ge.s32.totalorder %s1680_s20, 1 }
   0xc   : > { %p173_p1 = scmp.lt.s32.totalorder %s1680_s20, 3  ;;  %p1746_p2 = scmp.eq.s32.totalorder %s1407_s24, 0 }
   0xd   : > { %s30_s27 = sadd.s32 1, %s1676_s19  ;;  %s2697_s1 = sld [smem:[#allocation15_spill]] }
   0xe   : > { %s2695_s25 = scalar_select %p1746_p2, 1, 0 }
   0xf   : > { %p1750_p3 = pnand %p1409_p0, %p173_p1  ;;  %p1766_p6 = scmp.ge.s32.totalorder %s30_s27, 2 }
  0x10   : > { %s2700_s3 = sld [smem:[#allocation17_spill]] }
  0x11   : > { %s197_s23 = sshll.u32 %s2694_s2, 4  ;;  %p1528_p4 = pneg %p1750_p3  ;;  %s198_s23 = int_to_ptr.vmem [resolvable:$true] %s197_s23 }
  0x12   : > { %s2696_s26 = scalar_select %p1750_p3, 1, 0 }
  0x13   : > { %s186_s30 = sshll.u32 %s2697_s1, 4  ;;  %p1762_p5 = pnand %p1746_p2, %p1528_p4  ;;  %s187_s30 = int_to_ptr.vmem [resolvable:$true] %s186_s30 }
  0x14   : > { %s1586_s11 = scalar_lea.vmem %s198_s23, 16  ;;  %p1594_p11 = scmp.lt.s32.totalorder %s198_s23, %s198_s23 }
  0x15   : > { %p1587_p7 = scmp.ne.s32.totalorder %s198_s23, %s1586_s11  ;;  %p1588_p8 = pneg %p1762_p5 }
  0x16   : > { %s208_s10 = sshll.u32 %s2700_s3, 4  ;;  %p1595_p12 = scmp.lt.s32.totalorder %s1586_s11, %s1586_s11  ;;  %s209_s10 = int_to_ptr.vmem [resolvable:$true] %s208_s10 }
  0x17   : > { %p1589_p9 = pnand %p1588_p8, %p1587_p7 }
  0x18   : > { %p1596_p13 = por %p1595_p12, %p1594_p11 }
  0x19   : > { %p1590_p10 = pneg %p1589_p9 }
  0x1b   : > { %p1597_p0 = pnand %p1596_p13, %p1590_p10 }
  0x1d   : > { %1600 = shalt.err (!%p1597_p0)
}
  0x1e   : > { %s1682_s12 = smov [#allocation4]   ;;  %s2713_s27 = smov (%p1766_p6, %s30_s27), 0 }
  0x1f   : > { %1534 = dma.vmem_to_smem (!%p1762_p5), %s198_s23, 16, %s1682_s12, [#allocation5]  }
  0x20   : > { %2701 = sst [smem:[#allocation13_spill]] %s2713_s27  ;;  %s1601_s13 = scalar_lea.vmem %s187_s30, 64 }
  0x21   : > { %p1602_p1 = scmp.ne.s32.totalorder %s187_s30, %s1601_s13  ;;  %p1609_p9 = scmp.lt.s32.totalorder %s187_s30, %s187_s30 }
  0x22   : > { %p1610_p2 = scmp.lt.s32.totalorder %s1601_s13, %s1601_s13 }
  0x23   : > { %p1604_p4 = pnand %p1602_p1, %p1588_p8 }
  0x24   : > { %p1611_p11 = por %p1610_p2, %p1609_p9 }
  0x25   : > { %p1605_p7 = pneg %p1604_p4 }
  0x27   : > { %p1612_p10 = pnand %p1611_p11, %p1605_p7 }
  0x29   : > { %1615 = shalt.err (!%p1612_p10)
}
  0x2a   : > { %s1683_s14 = smov [#allocation2]   ;;  %s1616_s15 = scalar_lea.vmem %s209_s10, 64 }
  0x2b   : > { %1531 = dma.vmem_to_smem (!%p1762_p5), %s187_s30, 64, %s1683_s14, [#allocation3]  }
  0x2c   : > { %p1617_p6 = scmp.ne.s32.totalorder %s209_s10, %s1616_s15  ;;  %p1624_p0 = scmp.lt.s32.totalorder %s209_s10, %s209_s10 }
  0x2d   : > { %p1625_p1 = scmp.lt.s32.totalorder %s1616_s15, %s1616_s15 }
  0x2e   : > { %p1619_p12 = pnand %p1617_p6, %p1588_p8 }
  0x2f   : > { %p1626_p4 = por %p1625_p1, %p1624_p0 }
  0x30   : > { %p1620_p13 = pneg %p1619_p12 }
  0x32   : > { %p1627_p3 = pnand %p1626_p4, %p1620_p13 }
  0x34   : > { %1630 = shalt.err (!%p1627_p3)
}
  0x35   : > { %s1684_s16 = smov [#allocation6]   ;;  %s2702_s4 = sld [smem:[#allocation18_spill]] }
  0x36   : > { %1537 = dma.vmem_to_smem (!%p1762_p5), %s209_s10, 64, %s1684_s16, [#allocation5]  }
  0x3b   : > { %s219_s22 = sshll.u32 %s2702_s4, 4  ;;  %s220_s22 = int_to_ptr.vmem [resolvable:$true] %s219_s22 }
  0x3c   : > { %s1631_s23 = scalar_lea.vmem %s220_s22, 16  ;;  %p1639_p11 = scmp.lt.s32.totalorder %s220_s22, %s220_s22 }
  0x3d   : > { %p1632_p2 = scmp.ne.s32.totalorder %s220_s22, %s1631_s23  ;;  %p1640_p10 = scmp.lt.s32.totalorder %s1631_s23, %s1631_s23 }
  0x3f   : > { %p1634_p7 = pnand %p1632_p2, %p1588_p8  ;;  %p1641_p6 = por %p1640_p10, %p1639_p11 }
  0x41   : > { %p1635_p9 = pneg %p1634_p7 }
  0x43   : > { %p1642_p3 = pnand %p1641_p6, %p1635_p9 }
  0x45   : > { %1645 = shalt.err (!%p1642_p3)
}
  0x46   : > { %s1685_s24 = smov [#allocation7]   ;;  %p2703_p12 = scmp.ne.s32.totalorder %s2696_s26, 0 }
  0x47   : > { %1540 = dma.vmem_to_smem (!%p1762_p5), %s220_s22, 16, %s1685_s24, [#allocation8]  }
  0x48   : > { %240 = sbr.rel (%p2703_p12) target bundleno = 460 (0x1cc), region = 40  ;;  %p2704_p13 = scmp.ne.s32.totalorder (!%p2703_p12), %s2695_s25, 0 }
  0x4d   : > { %1659 = dma.done.wait (%p2704_p13), [#allocation3], 64  }
  0x4e   : > { %1661 = vsyncadd (%p2704_p13), [#allocation3], 4294967232 }
  0x4f   : > { %1663 = dma.done.wait (%p2704_p13), [#allocation5], 80  }
  0x50   : > { %1665 = vsyncadd (%p2704_p13), [#allocation5], 4294967216 }
  0x51   : > { %1667 = dma.done.wait (%p2704_p13), [#allocation8], 16  }
  0x52   : > { %1669 = vsyncadd (%p2704_p13), [#allocation8], 4294967280 }
  0x53   : > { %258 = sfence }
  0x54   : > { %p285_p5 = scmp.lt.s32.totalorder %s1672_s18, 1  ;;  %s1444_s26 = sld [smem:[#allocation2 + $0x81]]  ;;  %vm319_vm0 = vcmask 1046528   ;;  %vm337_vm1 = vcmask 1045504   ;;  %vm1152_vm2 = vcmask 130048   ;;  %vm1169_vm3 = vcmask 261248  }
  0x55   : > { %s1425_s28 = sld [smem:[#allocation2 + $0x1]]  ;;  %s1686_s10 = smov 127   ;;  %vm1186_vm4 = vcmask 392448   ;;  %vm1203_vm5 = vcmask 523648   ;;  %vm1220_vm6 = vcmask 654848   ;;  %vm1237_vm7 = vcmask 786048  }
  0x56   : > { %s2715_s18 = smov (!%p285_p5, %s1672_s18), 1  ;;  %s1426_s30 = sld [smem:[#allocation2 + $0x4]]  ;;  %vm1254_vm8 = vcmask 917248   ;;  %vm1271_vm9 = vcmask 1048448  }
  0x57   : > { %s1511_s29 = smul.u32 96, %s2715_s18  ;;  %s2705_s0 = sld [smem:[#allocation14_spill]] }
  0x58   : > { %s1445_s25 = sld [smem:[#allocation2 + $0x84]] }
  0x59   : > { %s1427_s9 = sld [smem:[#allocation2 + $0x7]] }
  0x5a   : > { %v559_v2 = vstv %s1444_s26  ;;  %s1848_s11 = sld [smem:[#allocation2 + $0x101]] }
  0x5b   : > { %v348_v6 = vstv %s1425_s28  ;;  %s1446_s12 = sld [smem:[#allocation2 + $0x87]] }
  0x5c   : > { %v362_v12 = vstv %s1426_s30  ;;  %s1466_s13 = sld [smem:[#allocation2 + $0x104]] }
  0x5d   : > { %s1824_s8 = scalar_lea.vmem %s2705_s0, %s1511_s29  ;;  %s1467_s14 = sld [smem:[#allocation2 + $0x107]] }
  0x5e   : > { %v1827_v0 = vld [vmem:[%s1824_s8 + $0x18] sm:$0xff]  ;;  %v1830_v1 = vld [vmem:[%s1824_s8 + $0x20] sm:$0xff]  ;;  %v1837_v5 = vld [vmem:[%s1824_s8 + $0x8] sm:$0xff]  ;;  %v573_v16 = vstv %s1445_s25  ;;  %s1876_s15 = sld [smem:[#allocation2 + $0x184]] }
  0x5f   : > { %v1833_v3 = vld [vmem:[%s1824_s8] sm:$0xff]  ;;  %v560_v4 = vmul.f32 %v1827_v0, %v559_v2  ;;  %v1840_v7 = vld [vmem:[%s1824_s8 + $0x10] sm:$0x3]  ;;  %v561_v8 = vmul.f32 %v1830_v1, %v559_v2  ;;  %v1846_v10 = vld [vmem:[%s1824_s8 + $0x28] sm:$0x3]  ;;  %v350_v11 = vmul.f32 %v348_v6, %v1837_v5  ;;  %v364_v13 = vmul.f32 %v362_v12, %v1837_v5  ;;  %s1881_s16 = sld [smem:[#allocation2 + $0x181]] }
  0x60   : > { %v349_v9 = vmul.f32 %v348_v6, %v1833_v3  ;;  %v365_v14 = vmul.f32 %v362_v12, %v1840_v7  ;;  %v363_v15 = vmul.f32 %v362_v12, %v1833_v3  ;;  %v575_v17 = vmul.f32 %v1830_v1, %v573_v16  ;;  %v1866_v31 = vld [vmem:[%s1824_s8 + $0x38] sm:$0xff]  ;;  %v1873_v36 = vld [vmem:[%s1824_s8 + $0x30] sm:$0xff]  ;;  %v1885_v43 = vld [vmem:[%s1824_s8 + $0x40] sm:$0x3]  ;;  %s1889_s17 = sld [smem:[#allocation2 + $0x5]] }
  0x61   : > { %564 = vrot.lane.b32.xlu1 %v560_v4, %s1686_s10  ;;  %v576_v18 = vmul.f32 %v1846_v10, %v573_v16  ;;  %v574_v19 = vmul.f32 %v1827_v0, %v573_v16  ;;  %v370_v20 = vrot.slane %v364_v13, 1  ;;  %v383_v26 = vstv %s1427_s9  ;;  %s1892_s21 = sld [smem:[#allocation2 + $0x2]]  ;;  %v1904_v57 = vld [vmem:[%s1824_s8 + $0x58] sm:$0x3]  ;;  %v1911_v61 = vld [vmem:[%s1824_s8 + $0x50] sm:$0xff] }
  0x62   : > { %353 = vrot.lane.b32.xlu0 %v349_v9, %s1686_s10  ;;  %v372_v21 = vrot.slane %v365_v14, 1  ;;  %v369_v22 = vrot.slane %v363_v15, 1  ;;  %v581_v23 = vrot.slane %v575_v17, 1  ;;  %v770_v29 = vstv %s1848_s11  ;;  %s1897_s22 = sld [smem:[#allocation2 + $0x82]]  ;;  %v1915_v63 = vld [vmem:[%s1824_s8 + $0x48] sm:$0xff]  ;;  %s1687_s11 = smov 126  }
  0x63   : > { %v583_v24 = vrot.slane %v576_v18, 1  ;;  %v580_v28 = vrot.slane %v574_v19, 1  ;;  %v385_v32 = vmul.f32 %v383_v26, %v1837_v5  ;;  %v386_v33 = vmul.f32 %v383_v26, %v1840_v7  ;;  %s1907_s23 = sld [smem:[#allocation2 + $0x85]] }
  0x64   : > { %v373_v25 = vsel %vm319_vm0, %v370_v20, %v372_v21  ;;  %v371_v27 = vsel %vm319_vm0, %v369_v22, %v370_v20  ;;  %v594_v34 = vstv %s1446_s12  ;;  %v384_v37 = vmul.f32 %v383_v26, %v1833_v3  ;;  %s1917_s24 = sld [smem:[#allocation2 + $0x88]] }
  0x65   : > { %566 = vrot.lane.b32.xlu1 %v561_v8, %s1686_s10  ;;  %v584_v30 = vsel %vm319_vm0, %v581_v23, %v583_v24  ;;  %v582_v35 = vsel %vm319_vm0, %v580_v28, %v581_v23  ;;  %v772_v38 = vmul.f32 %v1866_v31, %v770_v29  ;;  %v596_v39 = vmul.f32 %v1830_v1, %v594_v34  ;;  %s1927_s26 = sld [smem:[#allocation2 + $0x187]] }
  0x66   : > { %355 = vrot.lane.b32.xlu0 %v350_v11, %s1686_s10  ;;  %v391_v40 = vrot.slane %v385_v32, 2  ;;  %v393_v41 = vrot.slane %v386_v33, 2  ;;  %v597_v42 = vmul.f32 %v1846_v10, %v594_v34  ;;  %v784_v44 = vstv %s1466_s13  ;;  %s1932_s28 = sld [smem:[#allocation2 + $0x8]] }
  0x67   : > { %v771_v45 = vmul.f32 %v1873_v36, %v770_v29  ;;  %v390_v46 = vrot.slane %v384_v37, 2  ;;  %v595_v47 = vmul.f32 %v1827_v0, %v594_v34  ;;  %v786_v48 = vmul.f32 %v1866_v31, %v784_v44  ;;  %s1942_s29 = sld [smem:[#allocation2 + $0x108]] }
  0x68   : > { %v787_v49 = vmul.f32 %v1885_v43, %v784_v44  ;;  %v394_v50 = vsel %vm337_vm1, %v391_v40, %v393_v41  ;;  %v602_v51 = vrot.slane %v596_v39, 2  ;;  %v604_v52 = vrot.slane %v597_v42, 2  ;;  %s1955_s30 = sld [smem:[#allocation2 + $0x102]] }
  0x69   : > { %376 = vrot.lane.b32.xlu1 %v373_v25, %s1686_s10  ;;  %v785_v53 = vmul.f32 %v1873_v36, %v784_v44  ;;  %v805_v54 = vstv %s1467_s14  ;;  %v392_v55 = vsel %vm337_vm1, %v390_v46, %v391_v40  ;;  %v601_v56 = vrot.slane %v595_v47, 2  ;;  %s1981_s6 = sld [smem:[#allocation2 + $0x105]] }
  0x6a   : > { %374 = vrot.lane.b32.xlu0 %v371_v27, %s1686_s10  ;;  %v995_v58 = vstv %s1876_s15  ;;  %v792_v59 = vrot.slane %v786_v48, 1  ;;  %v794_v60 = vrot.slane %v787_v49, 1  ;;  %v981_v62 = vstv %s1881_s16  ;;  %s1988_s7 = sld [smem:[#allocation2 + $0x80]] }
  0x6b   : > { %v605_v2 = vsel %vm337_vm1, %v602_v51, %v604_v52  ;;  %v807_v4 = vmul.f32 %v1866_v31, %v805_v54  ;;  %v808_v6 = vmul.f32 %v1885_v43, %v805_v54  ;;  %v806_v8 = vmul.f32 %v1873_v36, %v805_v54  ;;  %s1994_s8 = sld [smem:[#allocation2 + $0x83]] }
  0x6c   : > { %v791_v9 = vrot.slane %v785_v53, 1  ;;  %v997_v11 = vmul.f32 %v1911_v61, %v995_v58  ;;  %v998_v12 = vmul.f32 %v1904_v57, %v995_v58  ;;  %v418_v13 = vstv %s1889_s17  ;;  %s2009_s25 = sld [smem:[#allocation2 + $0x86]] }
  0x6d   : > { %587 = vrot.lane.b32.xlu1 %v584_v30, %s1686_s10  ;;  %v603_v14 = vsel %vm337_vm1, %v601_v56, %v602_v51  ;;  %v983_v15 = vmul.f32 %v1911_v61, %v981_v62  ;;  %v982_v16 = vmul.f32 %v1915_v63, %v981_v62  ;;  %v795_v17 = vsel %vm319_vm0, %v792_v59, %v794_v60  ;;  %s2013_s9 = sld [smem:[#allocation2]] }
  0x6e   : > { %585 = vrot.lane.b32.xlu0 %v582_v35, %s1686_s10  ;;  %v404_v18 = vstv %s1892_s21  ;;  %v615_v19 = vstv %s1897_s22  ;;  %v996_v20 = vmul.f32 %v1915_v63, %v995_v58  ;;  %v813_v21 = vrot.slane %v807_v4, 2  ;;  %s2021_s12 = sld [smem:[#allocation2 + $0x3]] }
  0x6f   : > { %v815_v22 = vrot.slane %v808_v6, 2  ;;  %v812_v23 = vrot.slane %v806_v8, 2  ;;  %v1940_v24 = vmul.f32 %v418_v13, %v1837_v5  ;;  %v793_v25 = vsel %vm319_vm0, %v791_v9, %v792_v59  ;;  %s2025_s13 = sld [smem:[#allocation2 + $0x6]] }
  0x70   : > { %v1003_v26 = vrot.slane %v997_v11, 1  ;;  %v1005_v27 = vrot.slane %v998_v12, 1  ;;  %v421_v28 = vmul.f32 %v418_v13, %v1840_v7  ;;  %v406_v29 = vmul.f32 %v404_v18, %v1837_v5  ;;  %s2077_s14 = sld [smem:[#allocation2 + $0x100]] }
  0x71   : > { %777 = vrot.lane.b32.xlu1 %v772_v38, %s1686_s10  ;;  %v405_v30 = vmul.f32 %v404_v18, %v1833_v3  ;;  %v1950_v32 = vmul.f32 %v1830_v1, %v615_v19  ;;  %v1953_v33 = vmul.f32 %v1827_v0, %v615_v19  ;;  %v1002_v34 = vrot.slane %v996_v20, 1  ;;  %s2085_s15 = sld [smem:[#allocation2 + $0x103]] }
  0x72   : > { %775 = vrot.lane.b32.xlu0 %v771_v45, %s1686_s10  ;;  %v419_v35 = vmul.f32 %v418_v13, %v1833_v3  ;;  %v629_v37 = vstv %s1907_s23  ;;  %v650_v38 = vstv %s1917_s24  ;;  %v1962_v39 = vsel %vm337_vm1, %v813_v21, %v815_v22  ;;  %s2096_s16 = sld [smem:[#allocation2 + $0x106]] }
  0x73   : > { %v1965_v40 = vsel %vm337_vm1, %v812_v23, %v813_v21  ;;  %v426_v41 = vrot.slane %v1940_v24, 1  ;;  %v1969_v42 = vmul.f32 %v1830_v1, %v650_v38  ;;  %v1973_v44 = vsel %vm319_vm0, %v1003_v26, %v1005_v27  ;;  %s2104_s17 = sld [smem:[#allocation2 + $0x180]] }
  0x74   : > { %v428_v45 = vrot.slane %v421_v28, 1  ;;  %v1016_v46 = vstv %s1927_s26  ;;  %v651_v47 = vmul.f32 %v1827_v0, %v650_v38  ;;  %v631_v48 = vmul.f32 %v1830_v1, %v629_v37  ;;  %s2113_s21 = sld [smem:[#allocation2 + $0x183]] }
  0x75   : > { %397 = vrot.lane.b32.xlu1 %v394_v50, %s1686_s10  ;;  %v632_v49 = vmul.f32 %v1846_v10, %v629_v37  ;;  %v439_v50 = vstv %s1932_s28  ;;  %v658_v51 = vrot.slane %v1969_v42, 2  ;;  %v1985_v52 = vsel %vm319_vm0, %v1002_v34, %v1003_v26  ;;  %s2126_s22 = sld [smem:[#allocation2 + $0x186]] }
  0x76   : > { %395 = vrot.lane.b32.xlu0 %v392_v55, %s1686_s10  ;;  %v425_v53 = vrot.slane %v419_v35, 1  ;;  %v630_v54 = vmul.f32 %v1827_v0, %v629_v37  ;;  %v657_v55 = vrot.slane %v651_v47, 2  ;;  %v1018_v56 = vmul.f32 %v1911_v61, %v1016_v46  ;;  %s2177_s23 = sld [smem:[#allocation2 + $0x182]] }
  0x77   : > { %v1019_v58 = vmul.f32 %v1904_v57, %v1016_v46  ;;  %v1017_v59 = vmul.f32 %v1915_v63, %v1016_v46  ;;  %v861_v60 = vstv %s1942_s29  ;;  %v1998_v62 = vsel %vm319_vm0, %v426_v41, %v428_v45  ;;  %s1490_s24 = sld [smem:[#allocation2 + $0x185]] }
  0x78   : > { %v442_v4 = vmul.f32 %v439_v50, %v1840_v7  ;;  %v2007_v6 = vsel %vm337_vm1, %v657_v55, %v658_v51  ;;  %v637_v8 = vrot.slane %v631_v48, 1  ;;  %v639_v9 = vrot.slane %v632_v49, 1  ;;  %s2264_s26 = sld [smem:[#allocation4]] }
  0x79   : > { %608 = vrot.lane.b32.xlu1 %v605_v2, %s1686_s10  ;;  %v2001_v2 = vmul.f32 %v439_v50, %v1837_v5  ;;  %v826_v11 = vstv %s1955_s30  ;;  %v863_v12 = vmul.f32 %v1866_v31, %v861_v60  ;;  %v636_v13 = vrot.slane %v630_v54, 1  ;;  %s2268_s28 = sld [smem:[#allocation4 + $0x1]] }
  0x7a   : > { %606 = vrot.lane.b32.xlu0 %v603_v14, %s1686_s10  ;;  %v2017_v14 = vmul.f32 %v439_v50, %v1833_v3  ;;  %v1026_v18 = vrot.slane %v1019_v58, 2  ;;  %v1023_v19 = vrot.slane %v1017_v59, 2  ;;  %v449_v22 = vrot.slane %v442_v4, 2  ;;  %s2270_s29 = sld [smem:[#allocation6 + $0x1]] }
  0x7b   : > { %v869_v20 = vrot.slane %v863_v12, 2  ;;  %v447_v21 = vrot.slane %v2001_v2, 2  ;;  %v2031_v26 = vmul.f32 %v1866_v31, %v826_v11  ;;  %v2034_v27 = vmul.f32 %v1873_v36, %v826_v11  ;;  %s2272_s30 = sld [smem:[#allocation6 + $0x2]] }
  0x7c   : > { %v2037_v28 = vmul.f32 %v1846_v10, %v650_v38  ;;  %v2069_v46 = vstv %s1981_s6  ;;  %v525_v47 = vstv %s1994_s8  ;;  %v542_v48 = vstv %s2009_s25  ;;  %s2274_s6 = sld [smem:[#allocation6 + $0x3]] }
  0x7d   : > { %798 = vrot.lane.b32.xlu1 %v795_v17, %s1686_s10  ;;  %v1024_v17 = vrot.slane %v1018_v56, 2  ;;  %v2066_v45 = vsel %vm337_vm1, %v447_v21, %v449_v22  ;;  %v527_v50 = vmul.f32 %v1830_v1, %v525_v47  ;;  %v526_v54 = vmul.f32 %v1827_v0, %v525_v47  ;;  %s2280_s8 = sld [smem:[#allocation6 + $0x82]] }
  0x7e   : > { %796 = vrot.lane.b32.xlu0 %v793_v25, %s1686_s10  ;;  %v2028_v25 = vsel %vm319_vm0, %v425_v53, %v426_v41  ;;  %v519_v41 = vstv %s1988_s7  ;;  %v660_v49 = vrot.slane %v2037_v28, 2  ;;  %v544_v53 = vmul.f32 %v1830_v1, %v542_v48  ;;  %s2278_s7 = sld [smem:[#allocation6 + $0x81]] }
  0x7f   : > { %v2054_v37 = vsel %vm337_vm1, %v1024_v17, %v1026_v18  ;;  %v2057_v38 = vsel %vm337_vm1, %v1023_v19, %v1024_v17  ;;  %v543_v55 = vmul.f32 %v1827_v0, %v542_v48  ;;  %v306_v56 = vstv %s2013_s9  ;;  %s2284_s25 = sld [smem:[#allocation6 + $0x83]] }
  0x80   : > { %v312_v58 = vstv %s2021_s12  ;;  %v533_v59 = vrot.slane %v527_v50, 1  ;;  %v532_v4 = vrot.slane %v526_v54, 1  ;;  %v330_v11 = vstv %s2025_s13  ;;  %s2286_s9 = sld [smem:[#allocation6 + $0x4]] }
  0x81   : > { %988 = vrot.lane.b32.xlu1 %v983_v15, %s1686_s10  ;;  %v864_v15 = vmul.f32 %v1885_v43, %v861_v60  ;;  %v313_v12 = vmul.f32 %v312_v58, %v1833_v3  ;;  %v521_v19 = vmul.f32 %v1830_v1, %v519_v41  ;;  %v308_v50 = vmul.f32 %v306_v56, %v1837_v5  ;;  %s2292_s12 = sld [smem:[#allocation6 + $0x5]] }
  0x82   : > { %986 = vrot.lane.b32.xlu0 %v982_v16, %s1686_s10  ;;  %v862_v16 = vmul.f32 %v1873_v36, %v861_v60  ;;  %v550_v60 = vrot.slane %v544_v53, 2  ;;  %v315_v1 = vmul.f32 %v312_v58, %v1840_v7  ;;  %v730_v54 = vstv %s2077_s14  ;;  %s2296_s13 = sld [smem:[#allocation6 + $0x85]] }
  0x83   : > { %v871_v23 = vrot.slane %v864_v15, 2  ;;  %v332_v15 = vmul.f32 %v330_v11, %v1837_v5  ;;  %v320_v18 = vrot.slane %v313_v12, 1  ;;  %v1051_v28 = vstv %s1490_s24  ;;  %s2298_s14 = sld [smem:[#allocation6 + $0x6]] }
  0x84   : > { %v868_v24 = vrot.slane %v862_v16, 2  ;;  %v331_v16 = vmul.f32 %v330_v11, %v1833_v3  ;;  %v323_v53 = vrot.slane %v315_v1, 1  ;;  %s2318_s24 = sld [smem:[#allocation6 + $0x103]] }
  0x85   : > { %411 = vrot.lane.b32.xlu1 %v406_v29, %s1687_s11  ;;  %v2042_v29 = vsel %vm319_vm0, %v637_v8, %v639_v9  ;;  %v2048_v34 = vsel %vm337_vm1, %v869_v20, %v871_v23  ;;  %v549_v9 = vrot.slane %v543_v55, 2  ;;  %v528_v23 = vmul.f32 %v1846_v10, %v525_v47  ;;  %s2322_s0 = sld [smem:[#allocation4 + $0x3]] }
  0x86   : > { %409 = vrot.lane.b32.xlu0 %v405_v30, %s1687_s11  ;;  %v2045_v30 = vsel %vm319_vm0, %v636_v13, %v637_v8  ;;  %v2051_v35 = vsel %vm337_vm1, %v868_v24, %v869_v20  ;;  %v314_v8 = vmul.f32 %v312_v58, %v1837_v5  ;;  %v339_v20 = vrot.slane %v332_v15, 2  ;;  %s2324_s1 = sld [smem:[#allocation6 + $0x105]] }
  0x87   : > { %v338_v22 = vrot.slane %v331_v16, 2  ;;  %v545_v24 = vmul.f32 %v1846_v10, %v542_v48  ;;  %v535_v10 = vrot.slane %v528_v23, 1  ;;  %v732_v58 = vmul.f32 %v1866_v31, %v730_v54  ;;  %s2326_s2 = sld [smem:[#allocation6 + $0x106]] }
  0x88   : > { %v321_v13 = vrot.slane %v314_v8, 1  ;;  %s2328_s3 = sld [smem:[#allocation6]] }
  0x89   : > { %622 = vrot.lane.b32.xlu1 %v1950_v32, %s1687_s11  ;;  %v446_v32 = vrot.slane %v2017_v14, 2  ;;  %v340_v47 = vsel %vm337_vm1, %v338_v22, %v339_v20  ;;  %v552_v48 = vrot.slane %v545_v24, 2  ;;  %v536_v5 = vsel %vm319_vm0, %v533_v59, %v535_v10  ;;  %s2330_s4 = sld [smem:[#allocation6 + $0x181]] }
  0x8a   : > { %620 = vrot.lane.b32.xlu0 %v1953_v33, %s1687_s11  ;;  %v520_v33 = vmul.f32 %v1827_v0, %v519_v41  ;;  %v534_v0 = vsel %vm319_vm0, %v532_v4, %v533_v59  ;;  %v324_v4 = vsel %vm319_vm0, %v321_v13, %v323_v53  ;;  %v753_v59 = vstv %s2096_s16  ;;  %s2304_s16 = sld [smem:[#allocation6 + $0x86]] }
  0x8b   : > { %v756_v16 = vmul.f32 %v1885_v43, %v753_v59  ;;  %v661_v14 = vsel %vm337_vm1, %v658_v51, %v660_v49  ;;  %v1053_v49 = vmul.f32 %v1911_v61, %v1051_v28  ;;  %s2332_s27 = sld [smem:[#allocation6 + $0x182]] }
  0x8c   : > { %v539_v17 = vadd.f32 %v534_v0, %v520_v33  ;;  %v736_v33 = vstv %s2085_s15  ;;  %v755_v0 = vmul.f32 %v1866_v31, %v753_v59  ;;  %s2302_s15 = sld [smem:[#allocation4 + $0x2]] }
  0x8d   : > { %819 = vrot.lane.b32.xlu1 %v1962_v39, %s1686_s10  ;;  %v307_v39 = vmul.f32 %v306_v56, %v1833_v3  ;;  %v553_v56 = vsel %vm337_vm1, %v550_v60, %v552_v48  ;;  %v763_v23 = vrot.slane %v756_v16, 2  ;;  %v1054_v16 = vmul.f32 %v1904_v57, %v1051_v28  ;;  %s2338_s19 = sld [smem:[#allocation6 + $0x183]] }
  0x8e   : > { %817 = vrot.lane.b32.xlu0 %v1965_v40, %s1686_s10  ;;  %v551_v40 = vsel %vm337_vm1, %v549_v9, %v550_v60  ;;  %v328_v9 = vadd.f32 %v324_v4, %v308_v50  ;;  %v731_v60 = vmul.f32 %v1873_v36, %v730_v54 }
  0x8f   : > { %v2108_v3 = vadd.f32 %v551_v40, %v539_v17  ;;  %v737_v17 = vmul.f32 %v1873_v36, %v736_v33  ;;  %v761_v40 = vrot.slane %v755_v0, 2 }
  0x91   : > { %1009 = vrot.lane.b32.xlu1 %v1973_v44, %s1686_s10  ;;  %v322_v44 = vsel %vm319_vm0, %v320_v18, %v321_v13  ;;  %v941_v18 = vstv %s2104_s17  ;;  %v743_v24 = vrot.slane %v737_v17, 1  ;;  %s2308_s17 = sld [smem:[#allocation6 + $0x7]] }
  0x92   : > { %1007 = vrot.lane.b32.xlu0 %v1985_v52, %s1686_s10  ;;  %v327_v41 = vadd.f32 %v322_v44, %v307_v39  ;;  %v333_v52 = vmul.f32 %v330_v11, %v1840_v7  ;;  %v738_v7 = vmul.f32 %v1866_v31, %v736_v33  ;;  %v739_v11 = vmul.f32 %v1885_v43, %v736_v33 }
  0x93   : > { %v943_v10 = vmul.f32 %v1911_v61, %v941_v18 }
  0x94   : > { %v2121_v55 = vadd.f32 %v340_v47, %v327_v41  ;;  %v341_v8 = vrot.slane %v333_v52, 2  ;;  %v744_v12 = vrot.slane %v738_v7, 1  ;;  %v746_v15 = vrot.slane %v739_v11, 1 }
  0x95   : > { %432 = vrot.lane.b32.xlu1 %v1998_v62, %s1687_s11  ;;  %v540_v62 = vadd.f32 %v536_v5, %v521_v19  ;;  %v947_v19 = vstv %s2113_s21  ;;  %v764_v41 = vsel %vm337_vm1, %v761_v40, %v763_v23  ;;  %s2310_s21 = sld [smem:[#allocation6 + $0x87]] }
  0x96   : > { %430 = vrot.lane.b32.xlu0 %v2028_v25, %s1687_s11  ;;  %v342_v25 = vsel %vm337_vm1, %v339_v20, %v341_v8  ;;  %v842_v20 = vmul.f32 %v1866_v31, %v2069_v46  ;;  %v747_v22 = vsel %vm319_vm0, %v744_v12, %v746_v15  ;;  %v950_v1 = vmul.f32 %v1904_v57, %v947_v19 }
  0x97   : > { %v2137_v39 = vadd.f32 %v553_v56, %v540_v62  ;;  %v2141_v13 = vadd.f32 %v342_v25, %v328_v9  ;;  %v751_v44 = vadd.f32 %v747_v22, %v732_v58  ;;  %v745_v47 = vsel %vm319_vm0, %v743_v24, %v744_v12 }
  0x98   : > { %v964_v31 = vstv %s2126_s22  ;;  %v750_v53 = vadd.f32 %v745_v47, %v731_v60  ;;  %v957_v54 = vrot.slane %v950_v1, 1  ;;  %v948_v56 = vmul.f32 %v1915_v63, %v947_v19  ;;  %s2314_s22 = sld [smem:[#allocation6 + $0x101]] }
  0x99   : > { %643 = vrot.lane.b32.xlu1 %v2042_v29, %s1687_s11  ;;  %v754_v29 = vmul.f32 %v1873_v36, %v753_v59  ;;  %v2163_v48 = vadd.f32 %v764_v41, %v751_v44  ;;  %v966_v33 = vmul.f32 %v1911_v61, %v964_v31  ;;  %v967_v5 = vmul.f32 %v1904_v57, %v964_v31 }
  0x9a   : > { %641 = vrot.lane.b32.xlu0 %v2045_v30, %s1687_s11  ;;  %v949_v30 = vmul.f32 %v1911_v61, %v947_v19  ;;  %v843_v58 = vmul.f32 %v1885_v43, %v2069_v46  ;;  %v942_v62 = vmul.f32 %v1915_v63, %v941_v18  ;;  %v965_v4 = vmul.f32 %v1915_v63, %v964_v31 }
  0x9b   : > { %v760_v50 = vrot.slane %v754_v29, 2  ;;  %v972_v7 = vrot.slane %v966_v33, 2  ;;  %v974_v9 = vrot.slane %v967_v5, 2  ;;  %v954_v11 = vrot.slane %v948_v56, 1 }
  0x9c   : > { %v955_v52 = vrot.slane %v949_v30, 1  ;;  %v971_v59 = vrot.slane %v965_v4, 2  ;;  %v448_v43 = vsel %vm337_vm1, %v446_v32, %v447_v21  ;;  %v841_v60 = vmul.f32 %v1873_v36, %v2069_v46 }
  0x9d   : > { %833 = vrot.lane.b32.xlu1 %v2031_v26, %s1687_s11  ;;  %v762_v26 = vsel %vm337_vm1, %v760_v50, %v761_v40  ;;  %v975_v25 = vsel %vm337_vm1, %v972_v7, %v974_v9  ;;  %v848_v36 = vrot.slane %v842_v20, 1  ;;  %v850_v21 = vrot.slane %v843_v58, 1 }
  0x9e   : > { %831 = vrot.lane.b32.xlu0 %v2034_v27, %s1687_s11  ;;  %v2173_v27 = vadd.f32 %v762_v26, %v750_v53  ;;  %v958_v8 = vsel %vm319_vm0, %v955_v52, %v957_v54  ;;  %v956_v12 = vsel %vm319_vm0, %v954_v11, %v955_v52  ;;  %v973_v2 = vsel %vm337_vm1, %v971_v59, %v972_v7 }
  0x9f   : > { %v961_v0 = vadd.f32 %v956_v12, %v942_v62  ;;  %v847_v46 = vrot.slane %v841_v60, 1  ;;  %v1037_v15 = vstv %s2177_s23  ;;  %v1052_v29 = vmul.f32 %v1915_v63, %v1051_v28  ;;  %s2316_s23 = sld [smem:[#allocation6 + $0x102]] }
  0xa0   : > { %v1039_v51 = vmul.f32 %v1911_v61, %v1037_v15  ;;  %v1038_v17 = vmul.f32 %v1915_v63, %v1037_v15  ;;  %v1061_v18 = vrot.slane %v1054_v16, 1  ;;  %v460_v28 = vstv %s2264_s26  ;;  %s2364_s26 = sld [smem:[#allocation6 + $0x80]] }
  0xa1   : > { %1030 = vrot.lane.b32.xlu1 %v2054_v37, %s1686_s10  ;;  %v962_v37 = vadd.f32 %v958_v8, %v943_v10  ;;  %v2202_v32 = vadd.f32 %v973_v2, %v961_v0  ;;  %v849_v42 = vsel %vm319_vm0, %v847_v46, %v848_v36  ;;  %v1058_v22 = vrot.slane %v1052_v29, 1 }
  0xa2   : > { %1028 = vrot.lane.b32.xlu0 %v2057_v38, %s1686_s10  ;;  %s1491_s10 = sld [smem:[#allocation2 + $0x188]]  ;;  %v478_v16 = vstv %s2272_s30  ;;  %v484_v29 = vstv %s2274_s6 }
  0xa3   : > { %v2193_v38 = vadd.f32 %v975_v25, %v962_v37  ;;  %s2503_s30 = sld [smem:[#allocation7 + $0x2]] }
  0xa4   : > { %s2507_s6 = sld [smem:[#allocation6 + $0x185]] }
  0xa5   : > { %453 = vrot.lane.b32.xlu1 %v2066_v45, %s1687_s11  ;;  %v851_v45 = vsel %vm319_vm0, %v848_v36, %v850_v21 }
  0xa6   : > { %451 = vrot.lane.b32.xlu0 %v448_v43, %s1687_s11 }
  0xa8   : > { %v1072_v40 = vstv %s1491_s10  ;;  %s2320_s10 = sld [smem:[#allocation6 + $0x104]] }
  0xa9   : > { %664 = vrot.lane.b32.xlu1 %v661_v14, %s1687_s11  ;;  %v1074_v19 = vmul.f32 %v1911_v61, %v1072_v40  ;;  %v1075_v20 = vmul.f32 %v1904_v57, %v1072_v40  ;;  %v1073_v23 = vmul.f32 %v1915_v63, %v1072_v40 }
  0xaa   : > { %662 = vrot.lane.b32.xlu0 %v2007_v6, %s1687_s11  ;;  %v1059_v6 = vrot.slane %v1053_v49, 1  ;;  %v683_v49 = vstv %s2278_s7  ;;  %s2521_s7 = sld [smem:[#allocation6 + $0x186]] }
  0xab   : > { %v1080_v44 = vrot.slane %v1074_v19, 2  ;;  %v1082_v50 = vrot.slane %v1075_v20, 2  ;;  %v1079_v61 = vrot.slane %v1073_v23, 2  ;;  %v707_v23 = vstv %s2296_s13  ;;  %s2639_s13 = sld [smem:[#allocation7 + $0x7]] }
  0xac   : > { %v1062_v24 = vsel %vm319_vm0, %v1059_v6, %v1061_v18  ;;  %v1060_v30 = vsel %vm319_vm0, %v1058_v22, %v1059_v6  ;;  %v695_v6 = vstv %s2284_s25  ;;  %v490_v18 = vstv %s2286_s9  ;;  %s2548_s25 = sld [smem:[#allocation7 + $0x3]] }
  0xad   : > { %854 = vrot.lane.b32.xlu1 %v851_v45, %s1687_s11  ;;  %v1083_v57 = vsel %vm337_vm1, %v1080_v44, %v1082_v50  ;;  %v1081_v63 = vsel %vm337_vm1, %v1079_v61, %v1080_v44  ;;  %v496_v22 = vstv %s2292_s12  ;;  %v882_v50 = vstv %s2302_s15  ;;  %s2553_s9 = sld [smem:[#allocation7 + $0x4]]  ;;  %s1689_s12 = smov 32  }
  0xae   : > { %852 = vrot.lane.b32.xlu0 %v849_v42, %s1687_s11  ;;  %v671_v42 = vstv %s2268_s28  ;;  %v508_v61 = vstv %s2308_s17  ;;  %s2447_s28 = sld [smem:[#allocation6 + $0x184]]  ;;  %s1690_s15 = smov 48  }
  0xb1   : > { %1044 = vrot.lane.b32.xlu1 %v1039_v51, %s1687_s11  ;;  %v472_v51 = vstv %s2270_s29  ;;  %s2452_s29 = sld [smem:[#allocation7 + $0x1]] }
  0xb2   : > { %1042 = vrot.lane.b32.xlu0 %v1038_v17, %s1687_s11  ;;  %v689_v17 = vstv %s2280_s8  ;;  %s2535_s8 = sld [smem:[#allocation6 + $0x107]] }
  0xb5   : > { %875 = vrot.lane.b32.xlu1 %v2048_v34, %s1687_s11 }
  0xb6   : > { %873 = vrot.lane.b32.xlu0 %v2051_v35, %s1687_s11 }
  0xb9   : > { %1065 = vrot.lane.b32.xlu1 %v1062_v24, %s1687_s11  ;;  %v502_v24 = vstv %s2298_s14  ;;  %s1510_s14 = sshll.u32 %s2715_s18, 4  ;;  %s1691_s18 = smov 64  }
  0xba   : > { %1063 = vrot.lane.b32.xlu0 %v1060_v30, %s1687_s11  ;;  %v713_v30 = vstv %s2304_s16  ;;  %s2647_s17 = scalar_lea.vmem %s2683_s5, %s1510_s14 }
  0xbd   : > { %1086 = vrot.lane.b32.xlu1 %v1083_v57, %s1687_s11  ;;  %v719_v57 = vstv %s2310_s21  ;;  %s1692_s21 = smov 80  }
  0xbe   : > { %1084 = vrot.lane.b32.xlu0 %v1081_v63, %s1687_s11  ;;  %s2290_s11 = sld [smem:[#allocation6 + $0x84]] }
  0xc4   : > { %v701_v19 = vstv %s2290_s11  ;;  %s2563_s11 = sld [smem:[#allocation6 + $0x187]] }
  0xd3   : > { %v565_v34 = vpop.permute.xlu1 %564 }
  0xd4   : > { %v570_v1 = vadd.f32 %v565_v34, %v2108_v3  ;;  %v354_v41 = vpop.permute.xlu0 %353 }
  0xd5   : > { %v359_v35 = vadd.f32 %v354_v41, %v2121_v55  ;;  %v900_v41 = vstv %s2316_s23  ;;  %s1694_s23 = smov 112  }
  0xd7   : > { %v567_v47 = vpop.permute.xlu1 %566 }
  0xd8   : > { %v571_v10 = vadd.f32 %v567_v47, %v2137_v39  ;;  %v356_v31 = vpop.permute.xlu0 %355 }
  0xd9   : > { %v360_v53 = vadd.f32 %v356_v31, %v2141_v13  ;;  %v912_v31 = vstv %s2320_s10 }
  0xdb   : > { %v377_v26 = vpop.permute.xlu1 %376 }
  0xdc   : > { %v2238_v52 = vadd.f32 %v377_v26, %v360_v53  ;;  %v375_v54 = vpop.permute.xlu0 %374 }
  0xdd   : > { %v2240_v33 = vadd.f32 %v375_v54, %v359_v35 }
  0xdf   : > { %v588_v5 = vpop.permute.xlu1 %587 }
  0xe0   : > { %v2242_v56 = vadd.f32 %v588_v5, %v571_v10  ;;  %v586_v58 = vpop.permute.xlu0 %585  ;;  %v906_v10 = vstv %s2318_s24 }
  0xe1   : > { %v2244_v3 = vadd.f32 %v586_v58, %v570_v1  ;;  %v894_v1 = vstv %s2314_s22  ;;  %v1105_v58 = vstv %s2330_s4  ;;  %s2617_s4 = sld [smem:[#allocation7]]  ;;  %s1693_s22 = smov 96  }
  0xe3   : > { %v778_v62 = vpop.permute.xlu1 %777 }
  0xe4   : > { %v2247_v55 = vadd.f32 %v778_v62, %v2163_v48  ;;  %v776_v39 = vpop.permute.xlu0 %775  ;;  %v1111_v62 = vstv %s2332_s27  ;;  %s2624_s27 = sld [smem:[#allocation7 + $0x6]] }
  0xe5   : > { %v2250_v4 = vadd.f32 %v776_v39, %v2173_v27  ;;  %v1117_v39 = vstv %s2338_s19  ;;  %s1688_s19 = smov 16  }
  0xe7   : > { %v398_v13 = vpop.permute.xlu1 %397 }
  0xe8   : > { %v2252_v8 = vpop.permute.xlu0 %395  ;;  %v402_v20 = vadd.f32 %v398_v13, %v2238_v52  ;;  %v466_v13 = vstv %s2328_s3 }
  0xe9   : > { %v401_v63 = vadd.f32 %v2252_v8, %v2240_v33  ;;  %v924_v33 = vstv %s2326_s2  ;;  %s2610_s2 = sld [smem:[#allocation7 + $0x5]] }
  0xeb   : > { %v2254_v7 = vpop.permute.xlu1 %608 }
  0xec   : > { %v2256_v9 = vpop.permute.xlu0 %606  ;;  %v613_v26 = vadd.f32 %v2254_v7, %v2242_v56 }
  0xed   : > { %v612_v8 = vadd.f32 %v2256_v9, %v2244_v3 }
  0xef   : > { %v2258_v11 = vpop.permute.xlu1 %798 }
  0xf0   : > { %v2260_v37 = vpop.permute.xlu0 %796  ;;  %v803_v53 = vadd.f32 %v2258_v11, %v2247_v55 }
  0xf1   : > { %v802_v56 = vadd.f32 %v2260_v37, %v2250_v4 }
  0xf3   : > { %v2262_v59 = vpop.permute.xlu1 %988 }
  0xf4   : > { %v2266_v48 = vpop.permute.xlu0 %986  ;;  %v993_v7 = vadd.f32 %v2262_v59, %v2193_v38 }
  0xf7   : > { %v412_v27 = vpop.permute.xlu1 %411 }
  0xf8   : > { %v2276_v43 = vpop.permute.xlu0 %409  ;;  %v416_v34 = vadd.f32 %v412_v27, %v402_v20 }
  0xf9   : > { %v415_v52 = vadd.f32 %v2276_v43, %v401_v63  ;;  %v992_v43 = vadd.f32 %v2266_v48, %v2202_v32 }
  0xfb   : > { %v2282_v60 = vpop.permute.xlu1 %622 }
  0xfc   : > { %v2288_v25 = vpop.permute.xlu0 %620  ;;  %v627_v27 = vadd.f32 %v2282_v60, %v613_v26 }
  0xfd   : > { %v626_v63 = vadd.f32 %v2288_v25, %v612_v8 }
  0xff   : > { %v2294_v12 = vpop.permute.xlu1 %819 }
 0x100   : > { %v2300_v0 = vpop.permute.xlu0 %817 }
 0x101   : > { %v823_v55 = vadd.f32 %v2300_v0, %v802_v56 }
 0x103   : > { %v2306_v2 = vpop.permute.xlu1 %1009 }
 0x104   : > { %v2312_v14 = vpop.permute.xlu0 %1007  ;;  %v1014_v4 = vadd.f32 %v2306_v2, %v993_v7  ;;  %v677_v2 = vstv %s2364_s26 }
 0x105   : > { %v1013_v11 = vadd.f32 %v2312_v14, %v992_v43 }
 0x107   : > { %v433_v36 = vpop.permute.xlu1 %432 }
 0x108   : > { %v431_v21 = vpop.permute.xlu0 %430  ;;  %v437_v54 = vadd.f32 %v433_v36, %v416_v34 }
 0x109   : > { %v436_v20 = vadd.f32 %v431_v21, %v415_v52  ;;  %v824_v21 = vadd.f32 %v2294_v12, %v803_v53 }
 0x10b   : > { %v644_v46 = vpop.permute.xlu1 %643 }
 0x10c   : > { %v642_v45 = vpop.permute.xlu0 %641  ;;  %v648_v3 = vadd.f32 %v644_v46, %v627_v27 }
 0x10d   : > { %v647_v32 = vadd.f32 %v642_v45, %v626_v63 }
 0x10f   : > { %v2334_v15 = vpop.permute.xlu1 %833 }
 0x110   : > { %v832_v40 = vpop.permute.xlu0 %831  ;;  %v838_v25 = vadd.f32 %v2334_v15, %v824_v21 }
 0x111   : > { %v837_v12 = vadd.f32 %v832_v40, %v823_v55 }
 0x113   : > { %v1031_v44 = vpop.permute.xlu1 %1030 }
 0x114   : > { %v1029_v35 = vpop.permute.xlu0 %1028  ;;  %v1035_v0 = vadd.f32 %v1031_v44, %v1014_v4 }
 0x115   : > { %v2394_v14 = vadd.f32 %v1029_v35, %v1013_v11 }
 0x117   : > { %v454_v5 = vpop.permute.xlu1 %453 }
 0x118   : > { %v458_v47 = vadd.f32 %v454_v5, %v437_v54  ;;  %v452_v36 = vpop.permute.xlu0 %451 }
 0x119   : > { %v457_v60 = vadd.f32 %v452_v36, %v436_v20 }
 0x11a   : > { %v462_v9 = vadd.f32 %v460_v28, %v458_v47 }
 0x11b   : > { %v665_v38 = vpop.permute.xlu1 %664  ;;  %v461_v59 = vadd.f32 %v460_v28, %v457_v60 }
 0x11c   : > { %v2390_v37 = vmax.f32 %v462_v9, 0.0  ;;  %v669_v48 = vadd.f32 %v665_v38, %v648_v3  ;;  %v663_v46 = vpop.permute.xlu0 %662 }
 0x11d   : > { %v2396_v45 = vmax.f32 %v461_v59, 0.0  ;;  %v668_v28 = vadd.f32 %v663_v46, %v647_v32 }
 0x11e   : > { %v673_v34 = vadd.f32 %v671_v42, %v669_v48  ;;  %v474_v15 = vmul.f32 %v472_v51, %v2390_v37  ;;  %v480_v40 = vmul.f32 %v478_v16, %v2390_v37  ;;  %v486_v44 = vmul.f32 %v484_v29, %v2390_v37 }
 0x11f   : > { %v855_v47 = vpop.permute.xlu1 %854  ;;  %v492_v35 = vmul.f32 %v490_v18, %v2390_v37  ;;  %v672_v26 = vadd.f32 %v671_v42, %v668_v28  ;;  %v498_v54 = vmul.f32 %v496_v22, %v2390_v37  ;;  %v473_v8 = vmul.f32 %v472_v51, %v2396_v45 }
 0x120   : > { %v675_v53 = vmax.f32 %v673_v34, 0.0  ;;  %v859_v52 = vadd.f32 %v855_v47, %v838_v25  ;;  %v853_v5 = vpop.permute.xlu0 %852  ;;  %v479_v27 = vmul.f32 %v478_v16, %v2396_v45  ;;  %v485_v20 = vmul.f32 %v484_v29, %v2396_v45 }
 0x121   : > { %v491_v42 = vmul.f32 %v490_v18, %v2396_v45  ;;  %v2429_v56 = vmax.f32 %v672_v26, 0.0  ;;  %v497_v51 = vmul.f32 %v496_v22, %v2396_v45  ;;  %v858_v36 = vadd.f32 %v853_v5, %v837_v12 }
 0x122   : > { %v685_v7 = vmul.f32 %v683_v49, %v675_v53  ;;  %v691_v43 = vmul.f32 %v689_v17, %v675_v53  ;;  %v697_v63 = vmul.f32 %v695_v6, %v675_v53  ;;  %v703_v29 = vmul.f32 %v701_v19, %v675_v53 }
 0x123   : > { %v1045_v16 = vpop.permute.xlu1 %1044  ;;  %v709_v18 = vmul.f32 %v707_v23, %v675_v53  ;;  %v684_v9 = vmul.f32 %v683_v49, %v2429_v56  ;;  %v504_v22 = vmul.f32 %v502_v24, %v2390_v37  ;;  %v690_v55 = vmul.f32 %v689_v17, %v2429_v56 }
 0x124   : > { %v687_v3 = vadd.f32 %v685_v7, %v474_v15  ;;  %v693_v60 = vadd.f32 %v691_v43, %v480_v40  ;;  %v1043_v21 = vpop.permute.xlu0 %1042  ;;  %v699_v4 = vadd.f32 %v697_v63, %v486_v44  ;;  %v696_v49 = vmul.f32 %v695_v6, %v2429_v56 }
 0x125   : > { %v705_v11 = vadd.f32 %v703_v29, %v492_v35  ;;  %v1049_v38 = vadd.f32 %v1045_v16, %v1035_v0  ;;  %v686_v32 = vadd.f32 %v684_v9, %v473_v8  ;;  %v702_v59 = vmul.f32 %v701_v19, %v2429_v56 }
 0x126   : > { %v2463_v48 = vadd.f32 %v709_v18, %v498_v54  ;;  %v692_v12 = vadd.f32 %v690_v55, %v479_v27  ;;  %v698_v17 = vadd.f32 %v696_v49, %v485_v20  ;;  %v708_v46 = vmul.f32 %v707_v23, %v2429_v56 }
 0x127   : > { %v876_v25 = vpop.permute.xlu1 %875  ;;  %v715_v6 = vmul.f32 %v713_v30, %v675_v53  ;;  %v704_v34 = vadd.f32 %v702_v59, %v491_v42  ;;  %v503_v19 = vmul.f32 %v502_v24, %v2396_v45  ;;  %v714_v28 = vmul.f32 %v713_v30, %v2429_v56 }
 0x128   : > { %v880_v0 = vadd.f32 %v876_v25, %v859_v52  ;;  %v874_v47 = vpop.permute.xlu0 %873  ;;  %v710_v15 = vadd.f32 %v708_v46, %v497_v51  ;;  %v510_v23 = vmul.f32 %v508_v61, %v2390_v37  ;;  %v721_v44 = vmul.f32 %v719_v57, %v675_v53 }
 0x129   : > { %v717_v40 = vadd.f32 %v715_v6, %v504_v22  ;;  %v879_v26 = vadd.f32 %v874_v47, %v858_v36  ;;  %v2483_v52 = vadd.f32 %v714_v28, %v503_v19  ;;  %v509_v24 = vmul.f32 %v508_v61, %v2396_v45 }
 0x12a   : > { %v884_v35 = vadd.f32 %v882_v50, %v880_v0  ;;  %v2488_v54 = vadd.f32 %v721_v44, %v510_v23  ;;  %v720_v5 = vmul.f32 %v719_v57, %v2429_v56  ;;  %v679_v8 = vmul.f32 %v677_v2, %v675_v53 }
 0x12b   : > { %v1066_v30 = vpop.permute.xlu1 %1065  ;;  %v468_v27 = vmul.f32 %v466_v13, %v2390_v37  ;;  %v1048_v20 = vadd.f32 %v1043_v21, %v2394_v14  ;;  %v883_v61 = vadd.f32 %v882_v50, %v879_v26  ;;  %v1123_v7 = vstv %s2447_s28 }
 0x12c   : > { %v2499_v42 = vmax.f32 %v884_v35, 0.0  ;;  %v1070_v57 = vadd.f32 %v1066_v30, %v1049_v38  ;;  %v1064_v43 = vpop.permute.xlu0 %1063  ;;  %v1156_v53 = vstv %s2452_s29  ;;  %v2509_v37 = vadd.f32 %v720_v5, %v509_v24 }
 0x12d   : > { %v2511_v14 = vadd.f32 %v679_v8, %v468_v27  ;;  %v2513_v51 = vmax.f32 %v883_v61, 0.0  ;;  %v1069_v50 = vadd.f32 %v1064_v43, %v1048_v20  ;;  %v2706_v9 = vstv %s2324_s1  ;;  %s2570_s1 = sld [smem:[#allocation6 + $0x100]] }
 0x12e   : > { %v896_v36 = vmul.f32 %v894_v1, %v2499_v42  ;;  %v902_v16 = vmul.f32 %v900_v41, %v2499_v42  ;;  %v908_v29 = vmul.f32 %v906_v10, %v2499_v42  ;;  %v914_v18 = vmul.f32 %v912_v31, %v2499_v42 }
 0x12f   : > { %v1087_v63 = vpop.permute.xlu1 %1086  ;;  %v920_v22 = vmul.f32 %v2706_v9, %v2499_v42  ;;  %v926_v21 = vmul.f32 %v924_v33, %v2499_v42  ;;  %v895_v38 = vmul.f32 %v894_v1, %v2513_v51  ;;  %v901_v46 = vmul.f32 %v900_v41, %v2513_v51 }
 0x130   : > { %v1091_v55 = vadd.f32 %v1087_v63, %v1070_v57  ;;  %v898_v49 = vadd.f32 %v896_v36, %v687_v3  ;;  %v904_v59 = vadd.f32 %v902_v16, %v693_v60  ;;  %v1085_v25 = vpop.permute.xlu0 %1084  ;;  %v910_v6 = vadd.f32 %v908_v29, %v699_v4 }
 0x131   : > { %v907_v0 = vmul.f32 %v906_v10, %v2513_v51  ;;  %v916_v19 = vadd.f32 %v914_v18, %v705_v11  ;;  %v2707_v28 = vstv %s2322_s0  ;;  %v1090_v3 = vadd.f32 %v1085_v25, %v1069_v50  ;;  %s2589_s0 = sld [smem:[#allocation6 + $0x180]] }
 0x132   : > { %v1095_v47 = vadd.f32 %v2707_v28, %v1091_v55  ;;  %v897_v23 = vadd.f32 %v895_v38, %v686_v32  ;;  %v913_v1 = vmul.f32 %v912_v31, %v2513_v51  ;;  %v903_v60 = vadd.f32 %v901_v46, %v692_v12 }
 0x133   : > { %v909_v41 = vadd.f32 %v907_v0, %v698_v17  ;;  %v922_v10 = vadd.f32 %v920_v22, %v2463_v48  ;;  %v2708_v4 = vmov %v2706_v9  ;;  %v2709_v44 = vmov %v2707_v28 }
 0x134   : > { %v919_v11 = vmul.f32 %v2708_v4, %v2513_v51  ;;  %v2559_v32 = vmax.f32 %v1095_v47, 0.0  ;;  %v1094_v35 = vadd.f32 %v2709_v44, %v1090_v3  ;;  %v915_v31 = vadd.f32 %v913_v1, %v704_v34 }
 0x135   : > { %v928_v12 = vadd.f32 %v926_v21, %v717_v40  ;;  %v1173_v17 = vstv %s2503_s30  ;;  %v1129_v26 = vstv %s2507_s6  ;;  %v925_v48 = vmul.f32 %v924_v33, %v2513_v51 }
 0x136   : > { %v921_v24 = vadd.f32 %v919_v11, %v710_v15  ;;  %v2572_v30 = vmax.f32 %v1094_v35, 0.0  ;;  %v1107_v34 = vmul.f32 %v1105_v58, %v2559_v32  ;;  %v1113_v40 = vmul.f32 %v1111_v62, %v2559_v32 }
 0x137   : > { %v1119_v5 = vmul.f32 %v1117_v39, %v2559_v32  ;;  %v1125_v15 = vmul.f32 %v1123_v7, %v2559_v32  ;;  %v1135_v33 = vstv %s2521_s7  ;;  %v927_v8 = vadd.f32 %v925_v48, %v2483_v52 }
 0x138   : > { %v930_v27 = vstv %s2535_s8  ;;  %v1109_v20 = vadd.f32 %v1107_v34, %v898_v49  ;;  %v1106_v61 = vmul.f32 %v1105_v58, %v2572_v30  ;;  %v1115_v57 = vadd.f32 %v1113_v40, %v904_v59 }
 0x139   : > { %v1112_v43 = vmul.f32 %v1111_v62, %v2572_v30  ;;  %v1121_v50 = vadd.f32 %v1119_v5, %v910_v6  ;;  %v1118_v36 = vmul.f32 %v1117_v39, %v2572_v30  ;;  %v1127_v16 = vadd.f32 %v1125_v15, %v916_v19 }
 0x13a   : > { %v1124_v52 = vmul.f32 %v1123_v7, %v2572_v30  ;;  %v1158_v63 = vadd.f32 %v1156_v53, %v1109_v20  ;;  %v1108_v29 = vadd.f32 %v1106_v61, %v897_v23  ;;  %v1131_v18 = vmul.f32 %v1129_v26, %v2559_v32 }
 0x13b   : > { %v1114_v58 = vadd.f32 %v1112_v43, %v903_v60  ;;  %v1190_v9 = vstv %s2548_s25  ;;  %v1120_v22 = vadd.f32 %v1118_v36, %v909_v41  ;;  %v1137_v21 = vmul.f32 %v1135_v33, %v2559_v32 }
 0x13c   : > { %v1126_v62 = vadd.f32 %v1124_v52, %v915_v31  ;;  %v1160_v55 = vmax.f32 %v1158_v63, 0.0  ;;  %v1157_v39 = vadd.f32 %v1156_v53, %v1108_v29  ;;  %v1175_v49 = vadd.f32 %v1173_v17, %v1115_v57 }
 0x13d   : > { %v932_v7 = vmul.f32 %v930_v27, %v2499_v42  ;;  %v1207_v38 = vstv %s2553_s9  ;;  %v1141_v59 = vstv %s2563_s11  ;;  %v931_v25 = vmul.f32 %v930_v27, %v2513_v51 }
 0x13e   : > { %v888_v46 = vstv %s2570_s1  ;;  %1165 = vrot.lane.b32.xlu1 %v1160_v55, %s1688_s19  ;;  %v1159_v6 = vmax.f32 %v1157_v39, 0.0  ;;  %v1174_v0 = vadd.f32 %v1173_v17, %v1114_v58  ;;  %v1133_v19 = vadd.f32 %v1131_v18, %v922_v10 }
 0x13f   : > { %v1130_v53 = vmul.f32 %v1129_v26, %v2572_v30  ;;  %v1192_v28 = vadd.f32 %v1190_v9, %v1121_v50  ;;  %v1139_v47 = vadd.f32 %v1137_v21, %v928_v12  ;;  %v1136_v3 = vmul.f32 %v1135_v33, %v2572_v30 }
 0x140   : > { %v1099_v23 = vstv %s2589_s0  ;;  %1163 = vrot.lane.b32.xlu0 %v1159_v6, %s1688_s19  ;;  %v1177_v1 = vmax.f32 %v1175_v49, 0.0  ;;  %v934_v41 = vadd.f32 %v932_v7, %v2488_v54  ;;  %v1143_v4 = vmul.f32 %v1141_v59, %v2559_v32 }
 0x141   : > { %v1132_v60 = vadd.f32 %v1130_v53, %v921_v24  ;;  %v1138_v11 = vadd.f32 %v1136_v3, %v927_v8  ;;  %v933_v10 = vadd.f32 %v931_v25, %v2509_v37  ;;  %v1142_v44 = vmul.f32 %v1141_v59, %v2572_v30 }
 0x142   : > { %v678_v35 = vmul.f32 %v677_v2, %v2429_v56  ;;  %1182 = vrot.lane.b32.xlu1 %v1177_v1, %s1689_s12  ;;  %v1176_v31 = vmax.f32 %v1174_v0, 0.0  ;;  %v1191_v12 = vadd.f32 %v1190_v9, %v1120_v22  ;;  %v1145_v54 = vadd.f32 %v1143_v4, %v934_v41 }
 0x143   : > { %v890_v17 = vmul.f32 %v888_v46, %v2499_v42  ;;  %v1144_v26 = vadd.f32 %v1142_v44, %v933_v10  ;;  %v1101_v24 = vmul.f32 %v1099_v23, %v2559_v32  ;;  %v467_v37 = vmul.f32 %v466_v13, %v2396_v45 }
 0x144   : > { %1180 = vrot.lane.b32.xlu0 %v1176_v31, %s1689_s12  ;;  %v1194_v48 = vmax.f32 %v1192_v28, 0.0  ;;  %v1209_v34 = vadd.f32 %v1207_v38, %v1127_v16  ;;  %v889_v56 = vmul.f32 %v888_v46, %v2513_v51  ;;  %v1224_v40 = vstv %s2610_s2 }
 0x145   : > { %v892_v2 = vadd.f32 %v890_v17, %v2511_v14  ;;  %v1147_v5 = vstv %s2617_s4  ;;  %v1100_v42 = vmul.f32 %v1099_v23, %v2572_v30  ;;  %v680_v15 = vadd.f32 %v678_v35, %v467_v37 }
 0x146   : > { %1199 = vrot.lane.b32.xlu1 %v1194_v48, %s1690_s15  ;;  %v1193_v32 = vmax.f32 %v1191_v12, 0.0  ;;  %v1208_v13 = vadd.f32 %v1207_v38, %v1126_v62  ;;  %v1211_v8 = vmax.f32 %v1209_v34, 0.0  ;;  %v1226_v14 = vadd.f32 %v1224_v40, %v1133_v19 }
 0x147   : > { %v1103_v45 = vadd.f32 %v1101_v24, %v892_v2  ;;  %v891_v33 = vadd.f32 %v889_v56, %v680_v15  ;;  %v1241_v30 = vstv %s2624_s27  ;;  %v1225_v61 = vadd.f32 %v1224_v40, %v1132_v60 }
 0x148   : > { %1197 = vrot.lane.b32.xlu0 %v1193_v32, %s1690_s15  ;;  %v1210_v20 = vmax.f32 %v1208_v13, 0.0  ;;  %v1228_v50 = vmax.f32 %v1226_v14, 0.0  ;;  %v1243_v36 = vadd.f32 %v1241_v30, %v1139_v47  ;;  %v1258_v16 = vstv %s2639_s13 }
 0x149   : > { %v1149_v51 = vadd.f32 %v1147_v5, %v1103_v45  ;;  %v1102_v27 = vadd.f32 %v1100_v42, %v891_v33  ;;  %v1227_v63 = vmax.f32 %v1225_v61, 0.0  ;;  %v1242_v29 = vadd.f32 %v1241_v30, %v1138_v11 }
 0x14a   : > { %1216 = vrot.lane.b32.xlu1 %v1211_v8, %s1691_s18  ;;  %v1245_v58 = vmax.f32 %v1243_v36, 0.0  ;;  %v1260_v18 = vadd.f32 %v1258_v16, %v1145_v54  ;;  %v1259_v22 = vadd.f32 %v1258_v16, %v1144_v26 }
 0x14b   : > { %v1151_v57 = vmax.f32 %v1149_v51, 0.0  ;;  %v1148_v43 = vadd.f32 %v1147_v5, %v1102_v27  ;;  %v1244_v9 = vmax.f32 %v1242_v29, 0.0 }
 0x14c   : > { %1214 = vrot.lane.b32.xlu0 %v1210_v20, %s1691_s18  ;;  %v1262_v62 = vmax.f32 %v1260_v18, 0.0  ;;  %v1261_v21 = vmax.f32 %v1259_v22, 0.0 }
 0x14d   : > { %1154 = vst.msk [vmem:[%s2647_s17 + $0x8] sm:$0xff] %vm1152_vm2, %v1151_v57  ;;  %v1150_v52 = vmax.f32 %v1148_v43, 0.0 }
 0x14e   : > { %1233 = vrot.lane.b32.xlu1 %v1228_v50, %s1692_s21 }
 0x14f   : > { %1153 = vst.msk [vmem:[%s2647_s17] sm:$0xff] %vm1152_vm2, %v1150_v52 }
 0x150   : > { %1231 = vrot.lane.b32.xlu0 %v1227_v63, %s1692_s21 }
 0x152   : > { %1250 = vrot.lane.b32.xlu1 %v1245_v58, %s1693_s22 }
 0x154   : > { %1248 = vrot.lane.b32.xlu0 %v1244_v9, %s1693_s22 }
 0x156   : > { %1267 = vrot.lane.b32.xlu1 %v1262_v62, %s1694_s23 }
 0x158   : > { %1265 = vrot.lane.b32.xlu0 %v1261_v21, %s1694_s23 }
 0x1b0   : > { %v1166_v55 = vpop.permute.xlu1 %1165 }
 0x1b1   : > { %1171 = vst.msk [vmem:[%s2647_s17 + $0x8] sm:$0xff] %vm1169_vm3, %v1166_v55 }
 0x1b2   : > { %v1164_v39 = vpop.permute.xlu0 %1163 }
 0x1b3   : > { %1170 = vst.msk [vmem:[%s2647_s17] sm:$0xff] %vm1169_vm3, %v1164_v39 }
 0x1b4   : > { %v1183_v49 = vpop.permute.xlu1 %1182 }
 0x1b5   : > { %1188 = vst.msk [vmem:[%s2647_s17 + $0x8] sm:$0xff] %vm1186_vm4, %v1183_v49 }
 0x1b6   : > { %v1181_v7 = vpop.permute.xlu0 %1180 }
 0x1b7   : > { %1187 = vst.msk [vmem:[%s2647_s17] sm:$0xff] %vm1186_vm4, %v1181_v7 }
 0x1b8   : > { %v1200_v38 = vpop.permute.xlu1 %1199 }
 0x1b9   : > { %1205 = vst.msk [vmem:[%s2647_s17 + $0x8] sm:$0xff] %vm1203_vm5, %v1200_v38 }
 0x1ba   : > { %v1198_v59 = vpop.permute.xlu0 %1197 }
 0x1bb   : > { %1204 = vst.msk [vmem:[%s2647_s17] sm:$0xff] %vm1203_vm5, %v1198_v59 }
 0x1bc   : > { %v1217_v25 = vpop.permute.xlu1 %1216 }
 0x1bd   : > { %1222 = vst.msk [vmem:[%s2647_s17 + $0x8] sm:$0xff] %vm1220_vm6, %v1217_v25 }
 0x1be   : > { %v1215_v46 = vpop.permute.xlu0 %1214 }
 0x1bf   : > { %1221 = vst.msk [vmem:[%s2647_s17] sm:$0xff] %vm1220_vm6, %v1215_v46 }
 0x1c0   : > { %v1234_v6 = vpop.permute.xlu1 %1233 }
 0x1c1   : > { %1239 = vst.msk [vmem:[%s2647_s17 + $0x8] sm:$0xff] %vm1237_vm7, %v1234_v6 }
 0x1c2   : > { %v1232_v0 = vpop.permute.xlu0 %1231 }
 0x1c3   : > { %1238 = vst.msk [vmem:[%s2647_s17] sm:$0xff] %vm1237_vm7, %v1232_v0 }
 0x1c4   : > { %v1251_v19 = vpop.permute.xlu1 %1250 }
 0x1c5   : > { %1256 = vst.msk [vmem:[%s2647_s17 + $0x8] sm:$0xff] %vm1254_vm8, %v1251_v19 }
 0x1c6   : > { %v1249_v53 = vpop.permute.xlu0 %1248 }
 0x1c7   : > { %1255 = vst.msk [vmem:[%s2647_s17] sm:$0xff] %vm1254_vm8, %v1249_v53 }
 0x1c8   : > { %v1268_v28 = vpop.permute.xlu1 %1267 }
 0x1c9   : > { %1273 = vst.msk [vmem:[%s2647_s17 + $0x8] sm:$0xff] %vm1271_vm9, %v1268_v28 }
 0x1ca   : > { %v1266_v47 = vpop.permute.xlu0 %1265 }
 0x1cb   : > { %1272 = vst.msk [vmem:[%s2647_s17] sm:$0xff] %vm1271_vm9, %v1266_v47 }
 0x1cc PF: > { %s18_s20 = sadd.s32 1, %s1680_s20   ;;  %s2710_s18 = sld [smem:[#allocation12_spill]] }
 0x1cd   : > { %p15_p8 = scmp.ge.s32.totalorder %s18_s20, 4   ;;  %s2711_s19 = sld [smem:[#allocation13_spill]] }
 0x1cf   :  { %17 = sbr.rel (!%p15_p8) target bundleno = 10 (0xa), region = 91 }
 0x1d4   :  { %1304 = vsyncpa [#allocation3], 1 }
 0x1d5   :  { %1306 = vsyncpa [#allocation3 + $0x1], 1 }
 0x1d6   :  { %1307 = vsyncpa [#allocation5], 1 }
 0x1d7   :  { %1308 = vsyncpa [#allocation8], 1 }

</bundles_post_ra>
